<compile_context>
chip_gen: v5e
topology: v5e:2x2
jax: 0.10.0
libtpu: 0.0.40
codegen_flags: <defaults>
</compile_context>

<pallas_src>
import math
import functools

import jax
import jax.numpy as jnp
from jax import lax
from jax.experimental import pallas as pl
from jax.experimental.pallas import tpu as pltpu

_VMEM_LIMIT = 48 * 1024 * 1024  # explicit scoped-VMEM budget (under v7x 64 MiB/TC)


def _pick_tile(n, candidates):
    """Largest candidate that evenly divides n, else n itself (full extent)."""
    for c in candidates:
        if n >= c and n % c == 0:
            return c
    return n


# ----------------------------------------------------------------------------
# Kernel 1: Conv1D (GPT-2 style) == x @ W + b over flattened tokens, tiled.
# ----------------------------------------------------------------------------
def _linear_kernel(x_ref, w_ref, b_ref, o_ref):
    # bf16 MXU operands, f32 accumulation (3-4x MXU rate vs f32 on v5e/v6e/v7x).
    acc = jnp.dot(x_ref[...].astype(jnp.bfloat16),
                  w_ref[...].astype(jnp.bfloat16),
                  preferred_element_type=jnp.float32)
    o_ref[...] = (acc + b_ref[...].astype(jnp.float32)).astype(o_ref.dtype)


def conv1d(x2d, w, b, out_dtype=None):
    """x2d: (M, K), w: (K, N), b: (N,) -> (M, N) in out_dtype (default x dtype)."""
    M, K = x2d.shape
    N = w.shape[1]
    out_dtype = x2d.dtype if out_dtype is None else out_dtype

    tm = _pick_tile(M, (512, 256, 128, 64, 32, 16, 8))
    tn = _pick_tile(N, (1536, 1024, 512, 256, 128))
    nm, nn = M // tm, N // tn
    # TODO(synk): K is kept whole (fits VMEM for GPT-2-sized C); tile K with an
    # f32 accumulator if K grows beyond a few thousand.

    # Put the larger operand on the OUTER grid axis so its blocks are invariant
    # along the inner axis -> it is streamed from HBM exactly once; only the
    # smaller operand is re-streamed (outer-extent times).
    x_bytes = x2d.size * x2d.dtype.itemsize
    w_bytes = w.size * w.dtype.itemsize
    if w_bytes >= x_bytes:
        grid = (nn, nm)                       # weight invariant on inner axis
        x_map = lambda j, i: (i, 0)
        w_map = lambda j, i: (0, j)
        b_map = lambda j, i: (0, j)
        o_map = lambda j, i: (i, j)
    else:
        grid = (nm, nn)                       # activation invariant on inner axis
        x_map = lambda i, j: (i, 0)
        w_map = lambda i, j: (0, j)
        b_map = lambda i, j: (0, j)
        o_map = lambda i, j: (i, j)

    return pl.pallas_call(
        _linear_kernel,
        out_shape=jax.ShapeDtypeStruct((M, N), out_dtype),
        grid=grid,
        in_specs=[
            pl.BlockSpec((tm, K), x_map),
            pl.BlockSpec((K, tn), w_map),
            pl.BlockSpec((1, tn), b_map),
        ],
        out_specs=pl.BlockSpec((tm, tn), o_map),
        compiler_params=pltpu.CompilerParams(
            dimension_semantics=("parallel", "parallel"),
            vmem_limit_bytes=_VMEM_LIMIT),
    )(x2d, w, b.reshape(1, N))


# ----------------------------------------------------------------------------
# Kernel 2: causal flash attention over the fused qkv tensor (B, T, 3C).
#   Grid: (B, q_tiles, kv_tiles); all heads handled inside one invocation so
#   the all-head lane-dense K/V tile is DMA'd once and reused by every head.
# ----------------------------------------------------------------------------
def _flash_attn_kernel(q_ref, k_ref, v_ref, o_ref, m_sc, l_sc, acc_sc,
                       *, n_head, head_dim):
    qi = pl.program_id(1)
    kv = pl.program_id(2)
    D = head_dim
    tq = q_ref.shape[1]
    tk = k_ref.shape[1]

    @pl.when(kv == 0)
    def _init():
        m_sc[...] = jnp.full(m_sc.shape, -jnp.inf, m_sc.dtype)
        l_sc[...] = jnp.zeros(l_sc.shape, l_sc.dtype)
        acc_sc[...] = jnp.zeros(acc_sc.shape, acc_sc.dtype)

    def process_tile(apply_mask):
        if apply_mask:
            rows = qi * tq + lax.broadcasted_iota(jnp.int32, (tq, tk), 0)
            cols = kv * tk + lax.broadcasted_iota(jnp.int32, (tq, tk), 1)
            causal = rows >= cols
        # TODO(synk): for H much larger than ~12, bound live ranges with a
        # lax.fori_loop / extra grid axis over heads; kept a static unroll here
        # because dynamic lane-offset head slicing is fragile to lower.
        for h in range(n_head):
            q = q_ref[0, :, h * D:(h + 1) * D]          # (tq, D) bf16
            k = k_ref[0, :, h * D:(h + 1) * D]          # (tk, D) bf16
            v = v_ref[0, :, h * D:(h + 1) * D]          # (tk, D) bf16
            # q @ k^T via dot_general on the last dims (no transpose of k).
            s = lax.dot_general(q, k, (((1,), (1,)), ((), ())),
                                preferred_element_type=jnp.float32)  # (tq, tk) f32
            if apply_mask:
                # GPT-2 additive mask: masked logits become exactly -10000.
                s = jnp.where(causal, s, -10000.0)
            m_prev = m_sc[h]                                            # (tq, 1)
            m_new = jnp.maximum(m_prev, jnp.max(s, axis=-1, keepdims=True))
            alpha = jnp.exp(m_prev - m_new)                             # f32 (tq,1)
            # exp on the bf16 EUP path (v6e/v7x); row-sum & PV accumulate in f32.
            p = jnp.exp((s - m_new).astype(jnp.bfloat16))               # (tq, tk) bf16
            l_sc[h] = alpha * l_sc[h] + jnp.sum(p, axis=-1, keepdims=True,
                                                dtype=jnp.float32)
            acc_sc[h] = alpha * acc_sc[h] + jnp.dot(
                p, v, preferred_element_type=jnp.float32)
            m_sc[h] = m_new

    # Strictly-below-diagonal tile: fully unmasked -> mask-free fast path.
    @pl.when(kv < qi)
    def _full_tile():
        process_tile(apply_mask=False)

    # Diagonal tile: needs the causal mask; it is also the last tile that
    # contributes to this q block, so normalize and emit the output here.
    @pl.when(kv == qi)
    def _diag_tile_and_finalize():
        process_tile(apply_mask=True)
        for h in range(n_head):
            # Denominator is only a (tq, 1) vector; exact reciprocal is cheap.
            inv_l = pl.reciprocal(l_sc[h], approx=False)
            o_ref[0, :, h * D:(h + 1) * D] = (acc_sc[h] * inv_l).astype(o_ref.dtype)

    # kv > qi: fully masked -> skipped entirely; its K/V index_map aliases the
    # diagonal tile so no DMA is issued for it either.
    # TODO(synk): for T >= 2048 replace the skipped tiles with a
    # PrefetchScalarGridSpec flat grid over lower-triangular (qi, kv) pairs to
    # also remove the ~0.35us fixed per-step overhead of the empty steps.


def flash_attention(qkv3, *, n_head):
    """qkv3: (B, T, 3C) fused c_attn output -> attention out (B, T, C)."""
    B, T, C3 = qkv3.shape
    C = C3 // 3
    H = n_head
    D = C // H
    # Lane-dense layout needs C to be a multiple of 128 (true for GPT-2 sizes
    # 768/1024/1280).  TODO(synk): pad C for models where it is not (e.g. 1600).
    assert C % 128 == 0, "lane-dense attention layout requires C % 128 == 0"

    tq = _pick_tile(T, (512, 256, 128))   # 512 halves K/V re-streaming vs 256
    tk = tq
    num_q = T // tq
    # TODO(synk): on v5e/v6e (128 MiB VMEM) K/V could span the full T axis for
    # moderate T (K/V streamed once per batch row); on v7x prefer tq/tk <= 512
    # plus pipeline_mode=pl.Buffered(3) on the K/V specs if their DMA is exposed.

    kern = functools.partial(_flash_attn_kernel, n_head=H, head_dim=D)
    return pl.pallas_call(
        kern,
        out_shape=jax.ShapeDtypeStruct((B, T, C), qkv3.dtype),
        grid=(B, num_q, num_q),
        in_specs=[
            # q block: resident across the whole KV loop.
            pl.BlockSpec((1, tq, C), lambda b, qi, kv: (b, qi, 0)),
            # k / v blocks: fully-masked tiles alias the diagonal tile -> no DMA.
            pl.BlockSpec((1, tk, C),
                         lambda b, qi, kv: (b, jnp.minimum(kv, qi), 1)),
            pl.BlockSpec((1, tk, C),
                         lambda b, qi, kv: (b, jnp.minimum(kv, qi), 2)),
        ],
        # Lane-dense (tq, C) output slab in (B, T, C) layout.
        out_specs=pl.BlockSpec((1, tq, C), lambda b, qi, kv: (b, qi, 0)),
        scratch_shapes=[
            pltpu.VMEM((H, tq, 1), jnp.float32),   # running row max
            pltpu.VMEM((H, tq, 1), jnp.float32),   # running denominator
            pltpu.VMEM((H, tq, D), jnp.float32),   # output accumulator
        ],
        compiler_params=pltpu.CompilerParams(
            dimension_semantics=("parallel", "parallel", "arbitrary"),
            vmem_limit_bytes=_VMEM_LIMIT),
    )(qkv3, qkv3, qkv3)


# ----------------------------------------------------------------------------
# Full forward pass (glue reshapes in plain JAX, hot paths in Pallas kernels).
# ----------------------------------------------------------------------------
def attention_forward(x, params, n_head, scale=True):
    B, T, C = x.shape
    H = n_head
    D = C // H

    w_attn, b_attn = params["w_attn"], params["b_attn"]
    if scale:
        # Fold 1/sqrt(head_dim) into the query columns of c_attn (exact).
        col_scale = jnp.concatenate([
            jnp.full((C,), 1.0 / math.sqrt(D), dtype=w_attn.dtype),
            jnp.ones((2 * C,), dtype=w_attn.dtype)])
        w_attn = w_attn * col_scale[None, :]
        b_attn = b_attn * col_scale

    # c_attn: (B*T, C) @ (C, 3C) + b  -> fused qkv projection, emitted in bf16
    # so the attention kernel's K/V HBM streaming is halved.
    qkv = conv1d(x.reshape(B * T, C), w_attn, b_attn, out_dtype=jnp.bfloat16)
    qkv3 = qkv.reshape(B, T, 3 * C)                   # free reshape
    qkv5 = qkv.reshape(B, T, 3, H, D)                 # free reshape

    # present = stack(key.transpose(-2,-1), value) == (2, B, H, T, D)
    # TODO(synk): this stack+transpose is an extra XLA HBM pass; emit K/V in
    # (B, H, T, D) from a kernel (or keep (B, T, H, D) downstream) to remove it.
    present = jnp.stack([qkv5[:, :, 1].transpose(0, 2, 1, 3),
                         qkv5[:, :, 2].transpose(0, 2, 1, 3)])

    # TODO(synk): layer_past / attention_mask / head_mask / output_attentions
    # paths not implemented (None / False in the reference eval path).
    a = flash_attention(qkv3, n_head=H)               # (B, T, C) bf16

    # merge-heads is already the (B, T, C) layout; c_proj back to x.dtype.
    a = conv1d(a.reshape(B * T, C), params["w_proj"], params["b_proj"],
               out_dtype=x.dtype)
    a = a.reshape(B, T, C)

    # TODO(synk): attn_dropout / resid_dropout omitted (identity in eval mode).
    return a, present


# ----------------------------------------------------------------------------
# Pure-JAX f32 reference (for correctness check only).
# ----------------------------------------------------------------------------
def attention_ref(x, params, n_head, scale=True):
    B, T, C = x.shape
    D = C // n_head
    qkv = x.reshape(B * T, C) @ params["w_attn"] + params["b_attn"]
    qkv = qkv.reshape(B, T, 3 * C)
    q, k, v = jnp.split(qkv, 3, axis=2)
    sh = lambda t: t.reshape(B, T, n_head, D).transpose(0, 2, 1, 3)
    q, k, v = sh(q), sh(k), sh(v)
    w = jnp.einsum("bhqd,bhkd->bhqk", q, k)
    if scale:
        w = w / math.sqrt(D)
    b = jnp.tril(jnp.ones((T, T), dtype=x.dtype))
    w = w * b - 10000.0 * (1 - b)
    w = jax.nn.softmax(w, axis=-1)
    a = jnp.einsum("bhqk,bhkd->bhqd", w, v)
    a = a.transpose(0, 2, 1, 3).reshape(B * T, C)
    a = a @ params["w_proj"] + params["b_proj"]
    return a.reshape(B, T, C)


def _run_case(case_idx, B, T, C, n_head, scale):
    key = jax.random.fold_in(jax.random.PRNGKey(0), case_idx)
    k0, k1, k2, k3, k4 = jax.random.split(key, 5)
    params = {
        "w_attn": (0.02 * jax.random.normal(k0, (C, 3 * C))).astype(jnp.float32),
        "b_attn": (0.01 * jax.random.normal(k1, (3 * C,))).astype(jnp.float32),
        "w_proj": (0.02 * jax.random.normal(k2, (C, C))).astype(jnp.float32),
        "b_proj": (0.01 * jax.random.normal(k3, (C,))).astype(jnp.float32),
    }
    x = jax.random.normal(k4, (B, T, C), dtype=jnp.float32)

    fwd = jax.jit(functools.partial(attention_forward, n_head=n_head, scale=scale))
    out, present = fwd(x, params)
    out = jax.block_until_ready(out)
    present = jax.block_until_ready(present)

    D = C // n_head
    assert out.shape == (B, T, C)
    assert present.shape == (2, B, n_head, T, D)

    # bf16 MXU operands / bf16 qkv on the attention path -> relaxed tolerance
    # vs the pure-f32 reference.
    ref = attention_ref(x, params, n_head, scale)
    assert jnp.allclose(out, ref, atol=2e-2, rtol=2e-2), \
        f"output mismatch vs reference (case {case_idx})"

    qkv_ref = (x.reshape(B * T, C) @ params["w_attn"] + params["b_attn"]).reshape(
        B, T, 3, n_head, D)
    assert jnp.allclose(present[0].astype(jnp.float32),
                        qkv_ref[:, :, 1].transpose(0, 2, 1, 3),
                        atol=2e-2, rtol=2e-2), "present[key] mismatch"
    assert jnp.allclose(present[1].astype(jnp.float32),
                        qkv_ref[:, :, 2].transpose(0, 2, 1, 3),
                        atol=2e-2, rtol=2e-2), "present[value] mismatch"


if __name__ == "__main__":
    # Case 0: small config (single attention tile, single conv1d M tile).
    _run_case(0, B=2, T=8, C=128, n_head=4, scale=True)
    # Case 1: multi-tile config exercising the flash KV loop, the diagonal
    # masked path, the mask-free fast path, tile skipping / DMA aliasing and
    # the 8-head unroll (2 q-tiles x 2 kv-tiles at tq=tk=512).
    _run_case(1, B=2, T=1024, C=256, n_head=8, scale=True)

    print("KERNEL_OK")
</pallas_src>

<mosaic_0001>
module attributes {stable_mosaic.version = 11 : i64} {
  func.func @_linear_kernel(%arg0: i32, %arg1: i32, %arg2: memref<16x128xbf16, #tpu.memory_space<vmem>>, %arg3: memref<128x128xf32, #tpu.memory_space<vmem>>, %arg4: memref<1x128xf32, #tpu.memory_space<vmem>>, %arg5: memref<16x128xf32, #tpu.memory_space<vmem>>) attributes {dimension_semantics = [#tpu.dimension_semantics<parallel>, #tpu.dimension_semantics<parallel>], iteration_bounds = array<i64: 1, 1>, scalar_prefetch = 0 : i64, scratch_operands = 0 : i64, tpu.core_type = #tpu.core_type<tc>, window_params = [{transform_indices = @transform_0, window_bounds = array<i64: 16, 128>}, {transform_indices = @transform_1, window_bounds = array<i64: 128, 128>}, {transform_indices = @transform_2, window_bounds = array<i64: 1, 128>}, {transform_indices = @transform_3, window_bounds = array<i64: 16, 128>}]} {
    %c0 = arith.constant 0 : index
    %c0_0 = arith.constant 0 : index
    %0 = vector.load %arg2[%c0, %c0_0] : memref<16x128xbf16, #tpu.memory_space<vmem>>, vector<16x128xbf16>
    %c0_1 = arith.constant 0 : index
    %c0_2 = arith.constant 0 : index
    %1 = vector.load %arg3[%c0_1, %c0_2] : memref<128x128xf32, #tpu.memory_space<vmem>>, vector<128x128xf32>
    %2 = arith.truncf %1 : vector<128x128xf32> to vector<128x128xbf16>
    %cst = arith.constant dense<0.000000e+00> : vector<16x128xf32>
    %3 = tpu.matmul %0, %2, %cst {dimension_numbers = #tpu.dot_dimension_numbers<[1], [0], [0], [1], [0, 0, 1, 1], [], []>} : vector<16x128xbf16>, vector<128x128xbf16>, vector<16x128xf32> -> vector<16x128xf32>
    %c0_3 = arith.constant 0 : index
    %c0_4 = arith.constant 0 : index
    %4 = vector.load %arg4[%c0_3, %c0_4] : memref<1x128xf32, #tpu.memory_space<vmem>>, vector<1x128xf32>
    %5 = vector.broadcast %4 : vector<1x128xf32> to vector<16x128xf32>
    %6 = arith.addf %3, %5 : vector<16x128xf32>
    %c0_5 = arith.constant 0 : index
    %c0_6 = arith.constant 0 : index
    %7 = vector.load %arg5[%c0_5, %c0_6] : memref<16x128xf32, #tpu.memory_space<vmem>>, vector<16x128xf32>
    tpu.vector_store %arg5[%c0_5, %c0_6], %6 {strides = array<i32>} : memref<16x128xf32, #tpu.memory_space<vmem>>, vector<16x128xf32>,
    return
  }
  func.func @transform_0(%arg0: i32, %arg1: i32) -> (i32, i32) {
    %c0_i32 = arith.constant 0 : i32
    %c0_i32_0 = arith.constant 0 : i32
    return %arg1, %c0_i32 : i32, i32
  }
  func.func @transform_1(%arg0: i32, %arg1: i32) -> (i32, i32) {
    %c0_i32 = arith.constant 0 : i32
    %c0_i32_0 = arith.constant 0 : i32
    return %c0_i32, %arg0 : i32, i32
  }
  func.func @transform_2(%arg0: i32, %arg1: i32) -> (i32, i32) {
    %c0_i32 = arith.constant 0 : i32
    %c0_i32_0 = arith.constant 0 : i32
    return %c0_i32, %arg0 : i32, i32
  }
  func.func @transform_3(%arg0: i32, %arg1: i32) -> (i32, i32) {
    %c0_i32 = arith.constant 0 : i32
    return %arg1, %arg0 : i32, i32
  }
}

module attributes {stable_mosaic.version = 11 : i64} {
  func.func @_linear_kernel(%arg0: i32, %arg1: i32, %arg2: memref<16x128xf32, #tpu.memory_space<vmem>>, %arg3: memref<128x128xf32, #tpu.memory_space<vmem>>, %arg4: memref<1x128xf32, #tpu.memory_space<vmem>>, %arg5: memref<16x128xbf16, #tpu.memory_space<vmem>>) attributes {dimension_semantics = [#tpu.dimension_semantics<parallel>, #tpu.dimension_semantics<parallel>], iteration_bounds = array<i64: 3, 1>, scalar_prefetch = 0 : i64, scratch_operands = 0 : i64, tpu.core_type = #tpu.core_type<tc>, window_params = [{transform_indices = @transform_0, window_bounds = array<i64: 16, 128>}, {transform_indices = @transform_1, window_bounds = array<i64: 128, 128>}, {transform_indices = @transform_2, window_bounds = array<i64: 1, 128>}, {transform_indices = @transform_3, window_bounds = array<i64: 16, 128>}]} {
    %c0 = arith.constant 0 : index
    %c0_0 = arith.constant 0 : index
    %0 = vector.load %arg2[%c0, %c0_0] : memref<16x128xf32, #tpu.memory_space<vmem>>, vector<16x128xf32>
    %1 = arith.truncf %0 : vector<16x128xf32> to vector<16x128xbf16>
    %c0_1 = arith.constant 0 : index
    %c0_2 = arith.constant 0 : index
    %2 = vector.load %arg3[%c0_1, %c0_2] : memref<128x128xf32, #tpu.memory_space<vmem>>, vector<128x128xf32>
    %3 = arith.truncf %2 : vector<128x128xf32> to vector<128x128xbf16>
    %cst = arith.constant dense<0.000000e+00> : vector<16x128xf32>
    %4 = tpu.matmul %1, %3, %cst {dimension_numbers = #tpu.dot_dimension_numbers<[1], [0], [0], [1], [0, 0, 1, 1], [], []>} : vector<16x128xbf16>, vector<128x128xbf16>, vector<16x128xf32> -> vector<16x128xf32>
    %c0_3 = arith.constant 0 : index
    %c0_4 = arith.constant 0 : index
    %5 = vector.load %arg4[%c0_3, %c0_4] : memref<1x128xf32, #tpu.memory_space<vmem>>, vector<1x128xf32>
    %6 = vector.broadcast %5 : vector<1x128xf32> to vector<16x128xf32>
    %7 = arith.addf %4, %6 : vector<16x128xf32>
    %8 = arith.truncf %7 : vector<16x128xf32> to vector<16x128xbf16>
    %c0_5 = arith.constant 0 : index
    %c0_6 = arith.constant 0 : index
    %9 = vector.load %arg5[%c0_5, %c0_6] : memref<16x128xbf16, #tpu.memory_space<vmem>>, vector<16x128xbf16>
    tpu.vector_store %arg5[%c0_5, %c0_6], %8 {strides = array<i32>} : memref<16x128xbf16, #tpu.memory_space<vmem>>, vector<16x128xbf16>,
    return
  }
  func.func @transform_0(%arg0: i32, %arg1: i32) -> (i32, i32) {
    %c0_i32 = arith.constant 0 : i32
    %c0_i32_0 = arith.constant 0 : i32
    return %arg1, %c0_i32 : i32, i32
  }
  func.func @transform_1(%arg0: i32, %arg1: i32) -> (i32, i32) {
    %c0_i32 = arith.constant 0 : i32
    %c0_i32_0 = arith.constant 0 : i32
    return %c0_i32, %arg0 : i32, i32
  }
  func.func @transform_2(%arg0: i32, %arg1: i32) -> (i32, i32) {
    %c0_i32 = arith.constant 0 : i32
    %c0_i32_0 = arith.constant 0 : i32
    return %c0_i32, %arg0 : i32, i32
  }
  func.func @transform_3(%arg0: i32, %arg1: i32) -> (i32, i32) {
    %c0_i32 = arith.constant 0 : i32
    return %arg1, %arg0 : i32, i32
  }
}

module attributes {stable_mosaic.version = 11 : i64} {
  func.func @_flash_attn_kernel(%arg0: i32, %arg1: i32, %arg2: i32, %arg3: memref<1x8x128xbf16, #tpu.memory_space<vmem>>, %arg4: memref<1x8x128xbf16, #tpu.memory_space<vmem>>, %arg5: memref<1x8x128xbf16, #tpu.memory_space<vmem>>, %arg6: memref<1x8x128xbf16, #tpu.memory_space<vmem>>, %arg7: memref<4x8x1xf32, #tpu.memory_space<vmem>>, %arg8: memref<4x8x1xf32, #tpu.memory_space<vmem>>, %arg9: memref<4x8x32xf32, #tpu.memory_space<vmem>>) attributes {dimension_semantics = [#tpu.dimension_semantics<parallel>, #tpu.dimension_semantics<parallel>, #tpu.dimension_semantics<arbitrary>], iteration_bounds = array<i64: 2, 1, 1>, scalar_prefetch = 0 : i64, scratch_operands = 3 : i64, tpu.core_type = #tpu.core_type<tc>, window_params = [{transform_indices = @transform_0, window_bounds = array<i64: 1, 8, 128>}, {transform_indices = @transform_1, window_bounds = array<i64: 1, 8, 128>}, {transform_indices = @transform_2, window_bounds = array<i64: 1, 8, 128>}, {transform_indices = @transform_3, window_bounds = array<i64: 1, 8, 128>}]} {
    %c0_i32 = arith.constant 0 : i32
    %0 = arith.cmpi eq, %arg2, %c0_i32 : i32
    %1 = arith.extui %0 : i1 to i32
    %c0_i32_0 = arith.constant 0 : i32
    %2 = arith.cmpi ne, %1, %c0_i32_0 : i32
    scf.if %2 {
      %cst = arith.constant 0xFF800000 : f32
      %9 = vector.broadcast %cst : f32 to vector<4x8x1xf32>
      %c0 = arith.constant 0 : index
      %c0_3 = arith.constant 0 : index
      %c0_4 = arith.constant 0 : index
      %10 = vector.load %arg7[%c0, %c0_3, %c0_4] : memref<4x8x1xf32, #tpu.memory_space<vmem>>, vector<4x8x1xf32>
      tpu.vector_store %arg7[%c0, %c0_3, %c0_4], %9 {strides = array<i32>} : memref<4x8x1xf32, #tpu.memory_space<vmem>>, vector<4x8x1xf32>,
      %cst_5 = arith.constant 0.000000e+00 : f32
      %11 = vector.broadcast %cst_5 : f32 to vector<4x8x1xf32>
      %c0_6 = arith.constant 0 : index
      %c0_7 = arith.constant 0 : index
      %c0_8 = arith.constant 0 : index
      %12 = vector.load %arg8[%c0_6, %c0_7, %c0_8] : memref<4x8x1xf32, #tpu.memory_space<vmem>>, vector<4x8x1xf32>
      tpu.vector_store %arg8[%c0_6, %c0_7, %c0_8], %11 {strides = array<i32>} : memref<4x8x1xf32, #tpu.memory_space<vmem>>, vector<4x8x1xf32>,
      %cst_9 = arith.constant 0.000000e+00 : f32
      %13 = vector.broadcast %cst_9 : f32 to vector<4x8x32xf32>
      %c0_10 = arith.constant 0 : index
      %c0_11 = arith.constant 0 : index
      %c0_12 = arith.constant 0 : index
      %14 = vector.load %arg9[%c0_10, %c0_11, %c0_12] : memref<4x8x32xf32, #tpu.memory_space<vmem>>, vector<4x8x32xf32>
      tpu.vector_store %arg9[%c0_10, %c0_11, %c0_12], %13 {strides = array<i32>} : memref<4x8x32xf32, #tpu.memory_space<vmem>>, vector<4x8x32xf32>,
    } else {
    }
    %3 = arith.cmpi slt, %arg2, %arg1 : i32
    %4 = arith.extui %3 : i1 to i32
    %c0_i32_1 = arith.constant 0 : i32
    %5 = arith.cmpi ne, %4, %c0_i32_1 : i32
    scf.if %5 {
      %c0 = arith.constant 0 : index
      %c0_3 = arith.constant 0 : index
      %c0_4 = arith.constant 0 : index
      %9 = vector.load %arg3[%c0, %c0_3, %c0_4] : memref<1x8x128xbf16, #tpu.memory_space<vmem>>, vector<1x8x32xbf16>
      %10 = vector.shape_cast %9 : vector<1x8x32xbf16> to vector<8x32xbf16>
      %c0_5 = arith.constant 0 : index
      %c0_6 = arith.constant 0 : index
      %c0_7 = arith.constant 0 : index
      %11 = vector.load %arg4[%c0_5, %c0_6, %c0_7] : memref<1x8x128xbf16, #tpu.memory_space<vmem>>, vector<1x8x32xbf16>
      %12 = vector.shape_cast %11 : vector<1x8x32xbf16> to vector<8x32xbf16>
      %c0_8 = arith.constant 0 : index
      %c0_9 = arith.constant 0 : index
      %c0_10 = arith.constant 0 : index
      %13 = vector.load %arg5[%c0_8, %c0_9, %c0_10] : memref<1x8x128xbf16, #tpu.memory_space<vmem>>, vector<1x8x32xbf16>
      %14 = vector.shape_cast %13 : vector<1x8x32xbf16> to vector<8x32xbf16>
      %cst = arith.constant dense<0.000000e+00> : vector<8x8xf32>
      %15 = tpu.matmul %10, %12, %cst {dimension_numbers = #tpu.dot_dimension_numbers<[1], [1], [0], [0], [0, 0, 1, 0], [], []>} : vector<8x32xbf16>, vector<8x32xbf16>, vector<8x8xf32> -> vector<8x8xf32>
      %c0_11 = arith.constant 0 : index
      %c0_12 = arith.constant 0 : index
      %c0_13 = arith.constant 0 : index
      %16 = vector.load %arg7[%c0_11, %c0_12, %c0_13] : memref<4x8x1xf32, #tpu.memory_space<vmem>>, vector<1x8x1xf32>
      %17 = vector.shape_cast %16 : vector<1x8x1xf32> to vector<8x1xf32>
      %cst_14 = arith.constant dense<0xFF800000> : vector<8xf32>
      %18 = vector.multi_reduction <maximumf>, %15, %cst_14 [1] : vector<8x8xf32> to vector<8xf32>
      %19 = vector.shape_cast %18 : vector<8xf32> to vector<8x1xf32>
      %20 = arith.maximumf %17, %19 : vector<8x1xf32>
      %21 = arith.subf %17, %20 : vector<8x1xf32>
      %22 = math.exp %21 : vector<8x1xf32>
      %23 = vector.broadcast %20 : vector<8x1xf32> to vector<8x8xf32>
      %24 = arith.subf %15, %23 : vector<8x8xf32>
      %25 = arith.truncf %24 : vector<8x8xf32> to vector<8x8xbf16>
      %26 = math.exp %25 : vector<8x8xbf16>
      %c0_15 = arith.constant 0 : index
      %c0_16 = arith.constant 0 : index
      %c0_17 = arith.constant 0 : index
      %27 = vector.load %arg8[%c0_15, %c0_16, %c0_17] : memref<4x8x1xf32, #tpu.memory_space<vmem>>, vector<1x8x1xf32>
      %28 = vector.shape_cast %27 : vector<1x8x1xf32> to vector<8x1xf32>
      %29 = arith.mulf %22, %28 : vector<8x1xf32>
      %30 = arith.extf %26 : vector<8x8xbf16> to vector<8x8xf32>
      %cst_18 = arith.constant dense<0.000000e+00> : vector<8xf32>
      %31 = vector.multi_reduction <add>, %30, %cst_18 [1] : vector<8x8xf32> to vector<8xf32>
      %32 = vector.shape_cast %31 : vector<8xf32> to vector<8x1xf32>
      %33 = arith.addf %29, %32 : vector<8x1xf32>
      %c0_19 = arith.constant 0 : index
      %c0_20 = arith.constant 0 : index
      %c0_21 = arith.constant 0 : index
      %34 = vector.load %arg8[%c0_19, %c0_20, %c0_21] : memref<4x8x1xf32, #tpu.memory_space<vmem>>, vector<1x8x1xf32>
      %35 = vector.shape_cast %34 : vector<1x8x1xf32> to vector<8x1xf32>
      %36 = vector.shape_cast %33 : vector<8x1xf32> to vector<1x8x1xf32>
      tpu.vector_store %arg8[%c0_19, %c0_20, %c0_21], %36 {strides = array<i32>} : memref<4x8x1xf32, #tpu.memory_space<vmem>>, vector<1x8x1xf32>,
      %c0_22 = arith.constant 0 : index
      %c0_23 = arith.constant 0 : index
      %c0_24 = arith.constant 0 : index
      %37 = vector.load %arg9[%c0_22, %c0_23, %c0_24] : memref<4x8x32xf32, #tpu.memory_space<vmem>>, vector<1x8x32xf32>
      %38 = vector.shape_cast %37 : vector<1x8x32xf32> to vector<8x32xf32>
      %39 = vector.broadcast %22 : vector<8x1xf32> to vector<8x32xf32>
      %40 = arith.mulf %39, %38 : vector<8x32xf32>
      %cst_25 = arith.constant dense<0.000000e+00> : vector<8x32xf32>
      %41 = tpu.matmul %26, %14, %cst_25 {dimension_numbers = #tpu.dot_dimension_numbers<[1], [0], [0], [1], [0, 0, 1, 1], [], []>} : vector<8x8xbf16>, vector<8x32xbf16>, vector<8x32xf32> -> vector<8x32xf32>
      %42 = arith.addf %40, %41 : vector<8x32xf32>
      %c0_26 = arith.constant 0 : index
      %c0_27 = arith.constant 0 : index
      %c0_28 = arith.constant 0 : index
      %43 = vector.load %arg9[%c0_26, %c0_27, %c0_28] : memref<4x8x32xf32, #tpu.memory_space<vmem>>, vector<1x8x32xf32>
      %44 = vector.shape_cast %43 : vector<1x8x32xf32> to vector<8x32xf32>
      %45 = vector.shape_cast %42 : vector<8x32xf32> to vector<1x8x32xf32>
      tpu.vector_store %arg9[%c0_26, %c0_27, %c0_28], %45 {strides = array<i32>} : memref<4x8x32xf32, #tpu.memory_space<vmem>>, vector<1x8x32xf32>,
      %c0_29 = arith.constant 0 : index
      %c0_30 = arith.constant 0 : index
      %c0_31 = arith.constant 0 : index
      %46 = vector.load %arg7[%c0_29, %c0_30, %c0_31] : memref<4x8x1xf32, #tpu.memory_space<vmem>>, vector<1x8x1xf32>
      %47 = vector.shape_cast %46 : vector<1x8x1xf32> to vector<8x1xf32>
      %48 = vector.shape_cast %20 : vector<8x1xf32> to vector<1x8x1xf32>
      tpu.vector_store %arg7[%c0_29, %c0_30, %c0_31], %48 {strides = array<i32>} : memref<4x8x1xf32, #tpu.memory_space<vmem>>, vector<1x8x1xf32>,
      %c0_32 = arith.constant 0 : index
      %c0_33 = arith.constant 0 : index
      %c32 = arith.constant 32 : index
      %49 = vector.load %arg3[%c0_32, %c0_33, %c32] : memref<1x8x128xbf16, #tpu.memory_space<vmem>>, vector<1x8x32xbf16>
      %50 = vector.shape_cast %49 : vector<1x8x32xbf16> to vector<8x32xbf16>
      %c0_34 = arith.constant 0 : index
      %c0_35 = arith.constant 0 : index
      %c32_36 = arith.constant 32 : index
      %51 = vector.load %arg4[%c0_34, %c0_35, %c32_36] : memref<1x8x128xbf16, #tpu.memory_space<vmem>>, vector<1x8x32xbf16>
      %52 = vector.shape_cast %51 : vector<1x8x32xbf16> to vector<8x32xbf16>
      %c0_37 = arith.constant 0 : index
      %c0_38 = arith.constant 0 : index
      %c32_39 = arith.constant 32 : index
      %53 = vector.load %arg5[%c0_37, %c0_38, %c32_39] : memref<1x8x128xbf16, #tpu.memory_space<vmem>>, vector<1x8x32xbf16>
      %54 = vector.shape_cast %53 : vector<1x8x32xbf16> to vector<8x32xbf16>
      %cst_40 = arith.constant dense<0.000000e+00> : vector<8x8xf32>
      %55 = tpu.matmul %50, %52, %cst_40 {dimension_numbers = #tpu.dot_dimension_numbers<[1], [1], [0], [0], [0, 0, 1, 0], [], []>} : vector<8x32xbf16>, vector<8x32xbf16>, vector<8x8xf32> -> vector<8x8xf32>
      %c1 = arith.constant 1 : index
      %c0_41 = arith.constant 0 : index
      %c0_42 = arith.constant 0 : index
      %56 = vector.load %arg7[%c1, %c0_41, %c0_42] : memref<4x8x1xf32, #tpu.memory_space<vmem>>, vector<1x8x1xf32>
      %57 = vector.shape_cast %56 : vector<1x8x1xf32> to vector<8x1xf32>
      %cst_43 = arith.constant dense<0xFF800000> : vector<8xf32>
      %58 = vector.multi_reduction <maximumf>, %55, %cst_43 [1] : vector<8x8xf32> to vector<8xf32>
      %59 = vector.shape_cast %58 : vector<8xf32> to vector<8x1xf32>
      %60 = arith.maximumf %57, %59 : vector<8x1xf32>
      %61 = arith.subf %57, %60 : vector<8x1xf32>
      %62 = math.exp %61 : vector<8x1xf32>
      %63 = vector.broadcast %60 : vector<8x1xf32> to vector<8x8xf32>
      %64 = arith.subf %55, %63 : vector<8x8xf32>
      %65 = arith.truncf %64 : vector<8x8xf32> to vector<8x8xbf16>
      %66 = math.exp %65 : vector<8x8xbf16>
      %c1_44 = arith.constant 1 : index
      %c0_45 = arith.constant 0 : index
      %c0_46 = arith.constant 0 : index
      %67 = vector.load %arg8[%c1_44, %c0_45, %c0_46] : memref<4x8x1xf32, #tpu.memory_space<vmem>>, vector<1x8x1xf32>
      %68 = vector.shape_cast %67 : vector<1x8x1xf32> to vector<8x1xf32>
      %69 = arith.mulf %62, %68 : vector<8x1xf32>
      %70 = arith.extf %66 : vector<8x8xbf16> to vector<8x8xf32>
      %cst_47 = arith.constant dense<0.000000e+00> : vector<8xf32>
      %71 = vector.multi_reduction <add>, %70, %cst_47 [1] : vector<8x8xf32> to vector<8xf32>
      %72 = vector.shape_cast %71 : vector<8xf32> to vector<8x1xf32>
      %73 = arith.addf %69, %72 : vector<8x1xf32>
      %c1_48 = arith.constant 1 : index
      %c0_49 = arith.constant 0 : index
      %c0_50 = arith.constant 0 : index
      %74 = vector.load %arg8[%c1_48, %c0_49, %c0_50] : memref<4x8x1xf32, #tpu.memory_space<vmem>>, vector<1x8x1xf32>
      %75 = vector.shape_cast %74 : vector<1x8x1xf32> to vector<8x1xf32>
      %76 = vector.shape_cast %73 : vector<8x1xf32> to vector<1x8x1xf32>
      tpu.vector_store %arg8[%c1_48, %c0_49, %c0_50], %76 {strides = array<i32>} : memref<4x8x1xf32, #tpu.memory_space<vmem>>, vector<1x8x1xf32>,
      %c1_51 = arith.constant 1 : index
      %c0_52 = arith.constant 0 : index
      %c0_53 = arith.constant 0 : index
      %77 = vector.load %arg9[%c1_51, %c0_52, %c0_53] : memref<4x8x32xf32, #tpu.memory_space<vmem>>, vector<1x8x32xf32>
      %78 = vector.shape_cast %77 : vector<1x8x32xf32> to vector<8x32xf32>
      %79 = vector.broadcast %62 : vector<8x1xf32> to vector<8x32xf32>
      %80 = arith.mulf %79, %78 : vector<8x32xf32>
      %cst_54 = arith.constant dense<0.000000e+00> : vector<8x32xf32>
      %81 = tpu.matmul %66, %54, %cst_54 {dimension_numbers = #tpu.dot_dimension_numbers<[1], [0], [0], [1], [0, 0, 1, 1], [], []>} : vector<8x8xbf16>, vector<8x32xbf16>, vector<8x32xf32> -> vector<8x32xf32>
      %82 = arith.addf %80, %81 : vector<8x32xf32>
      %c1_55 = arith.constant 1 : index
      %c0_56 = arith.constant 0 : index
      %c0_57 = arith.constant 0 : index
      %83 = vector.load %arg9[%c1_55, %c0_56, %c0_57] : memref<4x8x32xf32, #tpu.memory_space<vmem>>, vector<1x8x32xf32>
      %84 = vector.shape_cast %83 : vector<1x8x32xf32> to vector<8x32xf32>
      %85 = vector.shape_cast %82 : vector<8x32xf32> to vector<1x8x32xf32>
      tpu.vector_store %arg9[%c1_55, %c0_56, %c0_57], %85 {strides = array<i32>} : memref<4x8x32xf32, #tpu.memory_space<vmem>>, vector<1x8x32xf32>,
      %c1_58 = arith.constant 1 : index
      %c0_59 = arith.constant 0 : index
      %c0_60 = arith.constant 0 : index
      %86 = vector.load %arg7[%c1_58, %c0_59, %c0_60] : memref<4x8x1xf32, #tpu.memory_space<vmem>>, vector<1x8x1xf32>
      %87 = vector.shape_cast %86 : vector<1x8x1xf32> to vector<8x1xf32>
      %88 = vector.shape_cast %60 : vector<8x1xf32> to vector<1x8x1xf32>
      tpu.vector_store %arg7[%c1_58, %c0_59, %c0_60], %88 {strides = array<i32>} : memref<4x8x1xf32, #tpu.memory_space<vmem>>, vector<1x8x1xf32>,
      %c0_61 = arith.constant 0 : index
      %c0_62 = arith.constant 0 : index
      %c64 = arith.constant 64 : index
      %89 = vector.load %arg3[%c0_61, %c0_62, %c64] : memref<1x8x128xbf16, #tpu.memory_space<vmem>>, vector<1x8x32xbf16>
      %90 = vector.shape_cast %89 : vector<1x8x32xbf16> to vector<8x32xbf16>
      %c0_63 = arith.constant 0 : index
      %c0_64 = arith.constant 0 : index
      %c64_65 = arith.constant 64 : index
      %91 = vector.load %arg4[%c0_63, %c0_64, %c64_65] : memref<1x8x128xbf16, #tpu.memory_space<vmem>>, vector<1x8x32xbf16>
      %92 = vector.shape_cast %91 : vector<1x8x32xbf16> to vector<8x32xbf16>
      %c0_66 = arith.constant 0 : index
      %c0_67 = arith.constant 0 : index
      %c64_68 = arith.constant 64 : index
      %93 = vector.load %arg5[%c0_66, %c0_67, %c64_68] : memref<1x8x128xbf16, #tpu.memory_space<vmem>>, vector<1x8x32xbf16>
      %94 = vector.shape_cast %93 : vector<1x8x32xbf16> to vector<8x32xbf16>
      %cst_69 = arith.constant dense<0.000000e+00> : vector<8x8xf32>
      %95 = tpu.matmul %90, %92, %cst_69 {dimension_numbers = #tpu.dot_dimension_numbers<[1], [1], [0], [0], [0, 0, 1, 0], [], []>} : vector<8x32xbf16>, vector<8x32xbf16>, vector<8x8xf32> -> vector<8x8xf32>
      %c2 = arith.constant 2 : index
      %c0_70 = arith.constant 0 : index
      %c0_71 = arith.constant 0 : index
      %96 = vector.load %arg7[%c2, %c0_70, %c0_71] : memref<4x8x1xf32, #tpu.memory_space<vmem>>, vector<1x8x1xf32>
      %97 = vector.shape_cast %96 : vector<1x8x1xf32> to vector<8x1xf32>
      %cst_72 = arith.constant dense<0xFF800000> : vector<8xf32>
      %98 = vector.multi_reduction <maximumf>, %95, %cst_72 [1] : vector<8x8xf32> to vector<8xf32>
      %99 = vector.shape_cast %98 : vector<8xf32> to vector<8x1xf32>
      %100 = arith.maximumf %97, %99 : vector<8x1xf32>
      %101 = arith.subf %97, %100 : vector<8x1xf32>
      %102 = math.exp %101 : vector<8x1xf32>
      %103 = vector.broadcast %100 : vector<8x1xf32> to vector<8x8xf32>
      %104 = arith.subf %95, %103 : vector<8x8xf32>
      %105 = arith.truncf %104 : vector<8x8xf32> to vector<8x8xbf16>
      %106 = math.exp %105 : vector<8x8xbf16>
      %c2_73 = arith.constant 2 : index
      %c0_74 = arith.constant 0 : index
      %c0_75 = arith.constant 0 : index
      %107 = vector.load %arg8[%c2_73, %c0_74, %c0_75] : memref<4x8x1xf32, #tpu.memory_space<vmem>>, vector<1x8x1xf32>
      %108 = vector.shape_cast %107 : vector<1x8x1xf32> to vector<8x1xf32>
      %109 = arith.mulf %102, %108 : vector<8x1xf32>
      %110 = arith.extf %106 : vector<8x8xbf16> to vector<8x8xf32>
      %cst_76 = arith.constant dense<0.000000e+00> : vector<8xf32>
      %111 = vector.multi_reduction <add>, %110, %cst_76 [1] : vector<8x8xf32> to vector<8xf32>
      %112 = vector.shape_cast %111 : vector<8xf32> to vector<8x1xf32>
      %113 = arith.addf %109, %112 : vector<8x1xf32>
      %c2_77 = arith.constant 2 : index
      %c0_78 = arith.constant 0 : index
      %c0_79 = arith.constant 0 : index
      %114 = vector.load %arg8[%c2_77, %c0_78, %c0_79] : memref<4x8x1xf32, #tpu.memory_space<vmem>>, vector<1x8x1xf32>
      %115 = vector.shape_cast %114 : vector<1x8x1xf32> to vector<8x1xf32>
      %116 = vector.shape_cast %113 : vector<8x1xf32> to vector<1x8x1xf32>
      tpu.vector_store %arg8[%c2_77, %c0_78, %c0_79], %116 {strides = array<i32>} : memref<4x8x1xf32, #tpu.memory_space<vmem>>, vector<1x8x1xf32>,
      %c2_80 = arith.constant 2 : index
      %c0_81 = arith.constant 0 : index
      %c0_82 = arith.constant 0 : index
      %117 = vector.load %arg9[%c2_80, %c0_81, %c0_82] : memref<4x8x32xf32, #tpu.memory_space<vmem>>, vector<1x8x32xf32>
      %118 = vector.shape_cast %117 : vector<1x8x32xf32> to vector<8x32xf32>
      %119 = vector.broadcast %102 : vector<8x1xf32> to vector<8x32xf32>
      %120 = arith.mulf %119, %118 : vector<8x32xf32>
      %cst_83 = arith.constant dense<0.000000e+00> : vector<8x32xf32>
      %121 = tpu.matmul %106, %94, %cst_83 {dimension_numbers = #tpu.dot_dimension_numbers<[1], [0], [0], [1], [0, 0, 1, 1], [], []>} : vector<8x8xbf16>, vector<8x32xbf16>, vector<8x32xf32> -> vector<8x32xf32>
      %122 = arith.addf %120, %121 : vector<8x32xf32>
      %c2_84 = arith.constant 2 : index
      %c0_85 = arith.constant 0 : index
      %c0_86 = arith.constant 0 : index
      %123 = vector.load %arg9[%c2_84, %c0_85, %c0_86] : memref<4x8x32xf32, #tpu.memory_space<vmem>>, vector<1x8x32xf32>
      %124 = vector.shape_cast %123 : vector<1x8x32xf32> to vector<8x32xf32>
      %125 = vector.shape_cast %122 : vector<8x32xf32> to vector<1x8x32xf32>
      tpu.vector_store %arg9[%c2_84, %c0_85, %c0_86], %125 {strides = array<i32>} : memref<4x8x32xf32, #tpu.memory_space<vmem>>, vector<1x8x32xf32>,
      %c2_87 = arith.constant 2 : index
      %c0_88 = arith.constant 0 : index
      %c0_89 = arith.constant 0 : index
      %126 = vector.load %arg7[%c2_87, %c0_88, %c0_89] : memref<4x8x1xf32, #tpu.memory_space<vmem>>, vector<1x8x1xf32>
      %127 = vector.shape_cast %126 : vector<1x8x1xf32> to vector<8x1xf32>
      %128 = vector.shape_cast %100 : vector<8x1xf32> to vector<1x8x1xf32>
      tpu.vector_store %arg7[%c2_87, %c0_88, %c0_89], %128 {strides = array<i32>} : memref<4x8x1xf32, #tpu.memory_space<vmem>>, vector<1x8x1xf32>,
      %c0_90 = arith.constant 0 : index
      %c0_91 = arith.constant 0 : index
      %c96 = arith.constant 96 : index
      %129 = vector.load %arg3[%c0_90, %c0_91, %c96] : memref<1x8x128xbf16, #tpu.memory_space<vmem>>, vector<1x8x32xbf16>
      %130 = vector.shape_cast %129 : vector<1x8x32xbf16> to vector<8x32xbf16>
      %c0_92 = arith.constant 0 : index
      %c0_93 = arith.constant 0 : index
      %c96_94 = arith.constant 96 : index
      %131 = vector.load %arg4[%c0_92, %c0_93, %c96_94] : memref<1x8x128xbf16, #tpu.memory_space<vmem>>, vector<1x8x32xbf16>
      %132 = vector.shape_cast %131 : vector<1x8x32xbf16> to vector<8x32xbf16>
      %c0_95 = arith.constant 0 : index
      %c0_96 = arith.constant 0 : index
      %c96_97 = arith.constant 96 : index
      %133 = vector.load %arg5[%c0_95, %c0_96, %c96_97] : memref<1x8x128xbf16, #tpu.memory_space<vmem>>, vector<1x8x32xbf16>
      %134 = vector.shape_cast %133 : vector<1x8x32xbf16> to vector<8x32xbf16>
      %cst_98 = arith.constant dense<0.000000e+00> : vector<8x8xf32>
      %135 = tpu.matmul %130, %132, %cst_98 {dimension_numbers = #tpu.dot_dimension_numbers<[1], [1], [0], [0], [0, 0, 1, 0], [], []>} : vector<8x32xbf16>, vector<8x32xbf16>, vector<8x8xf32> -> vector<8x8xf32>
      %c3 = arith.constant 3 : index
      %c0_99 = arith.constant 0 : index
      %c0_100 = arith.constant 0 : index
      %136 = vector.load %arg7[%c3, %c0_99, %c0_100] : memref<4x8x1xf32, #tpu.memory_space<vmem>>, vector<1x8x1xf32>
      %137 = vector.shape_cast %136 : vector<1x8x1xf32> to vector<8x1xf32>
      %cst_101 = arith.constant dense<0xFF800000> : vector<8xf32>
      %138 = vector.multi_reduction <maximumf>, %135, %cst_101 [1] : vector<8x8xf32> to vector<8xf32>
      %139 = vector.shape_cast %138 : vector<8xf32> to vector<8x1xf32>
      %140 = arith.maximumf %137, %139 : vector<8x1xf32>
      %141 = arith.subf %137, %140 : vector<8x1xf32>
      %142 = math.exp %141 : vector<8x1xf32>
      %143 = vector.broadcast %140 : vector<8x1xf32> to vector<8x8xf32>
      %144 = arith.subf %135, %143 : vector<8x8xf32>
      %145 = arith.truncf %144 : vector<8x8xf32> to vector<8x8xbf16>
      %146 = math.exp %145 : vector<8x8xbf16>
      %c3_102 = arith.constant 3 : index
      %c0_103 = arith.constant 0 : index
      %c0_104 = arith.constant 0 : index
      %147 = vector.load %arg8[%c3_102, %c0_103, %c0_104] : memref<4x8x1xf32, #tpu.memory_space<vmem>>, vector<1x8x1xf32>
      %148 = vector.shape_cast %147 : vector<1x8x1xf32> to vector<8x1xf32>
      %149 = arith.mulf %142, %148 : vector<8x1xf32>
      %150 = arith.extf %146 : vector<8x8xbf16> to vector<8x8xf32>
      %cst_105 = arith.constant dense<0.000000e+00> : vector<8xf32>
      %151 = vector.multi_reduction <add>, %150, %cst_105 [1] : vector<8x8xf32> to vector<8xf32>
      %152 = vector.shape_cast %151 : vector<8xf32> to vector<8x1xf32>
      %153 = arith.addf %149, %152 : vector<8x1xf32>
      %c3_106 = arith.constant 3 : index
      %c0_107 = arith.constant 0 : index
      %c0_108 = arith.constant 0 : index
      %154 = vector.load %arg8[%c3_106, %c0_107, %c0_108] : memref<4x8x1xf32, #tpu.memory_space<vmem>>, vector<1x8x1xf32>
      %155 = vector.shape_cast %154 : vector<1x8x1xf32> to vector<8x1xf32>
      %156 = vector.shape_cast %153 : vector<8x1xf32> to vector<1x8x1xf32>
      tpu.vector_store %arg8[%c3_106, %c0_107, %c0_108], %156 {strides = array<i32>} : memref<4x8x1xf32, #tpu.memory_space<vmem>>, vector<1x8x1xf32>,
      %c3_109 = arith.constant 3 : index
      %c0_110 = arith.constant 0 : index
      %c0_111 = arith.constant 0 : index
      %157 = vector.load %arg9[%c3_109, %c0_110, %c0_111] : memref<4x8x32xf32, #tpu.memory_space<vmem>>, vector<1x8x32xf32>
      %158 = vector.shape_cast %157 : vector<1x8x32xf32> to vector<8x32xf32>
      %159 = vector.broadcast %142 : vector<8x1xf32> to vector<8x32xf32>
      %160 = arith.mulf %159, %158 : vector<8x32xf32>
      %cst_112 = arith.constant dense<0.000000e+00> : vector<8x32xf32>
      %161 = tpu.matmul %146, %134, %cst_112 {dimension_numbers = #tpu.dot_dimension_numbers<[1], [0], [0], [1], [0, 0, 1, 1], [], []>} : vector<8x8xbf16>, vector<8x32xbf16>, vector<8x32xf32> -> vector<8x32xf32>
      %162 = arith.addf %160, %161 : vector<8x32xf32>
      %c3_113 = arith.constant 3 : index
      %c0_114 = arith.constant 0 : index
      %c0_115 = arith.constant 0 : index
      %163 = vector.load %arg9[%c3_113, %c0_114, %c0_115] : memref<4x8x32xf32, #tpu.memory_space<vmem>>, vector<1x8x32xf32>
      %164 = vector.shape_cast %163 : vector<1x8x32xf32> to vector<8x32xf32>
      %165 = vector.shape_cast %162 : vector<8x32xf32> to vector<1x8x32xf32>
      tpu.vector_store %arg9[%c3_113, %c0_114, %c0_115], %165 {strides = array<i32>} : memref<4x8x32xf32, #tpu.memory_space<vmem>>, vector<1x8x32xf32>,
      %c3_116 = arith.constant 3 : index
      %c0_117 = arith.constant 0 : index
      %c0_118 = arith.constant 0 : index
      %166 = vector.load %arg7[%c3_116, %c0_117, %c0_118] : memref<4x8x1xf32, #tpu.memory_space<vmem>>, vector<1x8x1xf32>
      %167 = vector.shape_cast %166 : vector<1x8x1xf32> to vector<8x1xf32>
      %168 = vector.shape_cast %140 : vector<8x1xf32> to vector<1x8x1xf32>
      tpu.vector_store %arg7[%c3_116, %c0_117, %c0_118], %168 {strides = array<i32>} : memref<4x8x1xf32, #tpu.memory_space<vmem>>, vector<1x8x1xf32>,
    } else {
    }
    %6 = arith.cmpi eq, %arg2, %arg1 : i32
    %7 = arith.extui %6 : i1 to i32
    %c0_i32_2 = arith.constant 0 : i32
    %8 = arith.cmpi ne, %7, %c0_i32_2 : i32
    scf.if %8 {
      %c8_i32 = arith.constant 8 : i32
      %9 = arith.muli %arg1, %c8_i32 : i32
      %10 = tpu.iota {dimensions = array<i32: 0>} : vector<8x8xi32>
      %11 = vector.broadcast %9 : i32 to vector<8x8xi32>
      %12 = arith.addi %11, %10 : vector<8x8xi32>
      %c8_i32_3 = arith.constant 8 : i32
      %13 = arith.muli %arg2, %c8_i32_3 : i32
      %14 = tpu.iota {dimensions = array<i32: 1>} : vector<8x8xi32>
      %15 = vector.broadcast %13 : i32 to vector<8x8xi32>
      %16 = arith.addi %15, %14 : vector<8x8xi32>
      %17 = arith.cmpi sge, %12, %16 : vector<8x8xi32>
      %c0 = arith.constant 0 : index
      %c0_4 = arith.constant 0 : index
      %c0_5 = arith.constant 0 : index
      %18 = vector.load %arg3[%c0, %c0_4, %c0_5] : memref<1x8x128xbf16, #tpu.memory_space<vmem>>, vector<1x8x32xbf16>
      %19 = vector.shape_cast %18 : vector<1x8x32xbf16> to vector<8x32xbf16>
      %c0_6 = arith.constant 0 : index
      %c0_7 = arith.constant 0 : index
      %c0_8 = arith.constant 0 : index
      %20 = vector.load %arg4[%c0_6, %c0_7, %c0_8] : memref<1x8x128xbf16, #tpu.memory_space<vmem>>, vector<1x8x32xbf16>
      %21 = vector.shape_cast %20 : vector<1x8x32xbf16> to vector<8x32xbf16>
      %c0_9 = arith.constant 0 : index
      %c0_10 = arith.constant 0 : index
      %c0_11 = arith.constant 0 : index
      %22 = vector.load %arg5[%c0_9, %c0_10, %c0_11] : memref<1x8x128xbf16, #tpu.memory_space<vmem>>, vector<1x8x32xbf16>
      %23 = vector.shape_cast %22 : vector<1x8x32xbf16> to vector<8x32xbf16>
      %cst = arith.constant dense<0.000000e+00> : vector<8x8xf32>
      %24 = tpu.matmul %19, %21, %cst {dimension_numbers = #tpu.dot_dimension_numbers<[1], [1], [0], [0], [0, 0, 1, 0], [], []>} : vector<8x32xbf16>, vector<8x32xbf16>, vector<8x8xf32> -> vector<8x8xf32>
      %cst_12 = arith.constant -1.000000e+04 : f32
      %25 = vector.broadcast %cst_12 : f32 to vector<8x8xf32>
      %26 = arith.select %17, %24, %25 : vector<8x8xi1>, vector<8x8xf32>
      %c0_13 = arith.constant 0 : index
      %c0_14 = arith.constant 0 : index
      %c0_15 = arith.constant 0 : index
      %27 = vector.load %arg7[%c0_13, %c0_14, %c0_15] : memref<4x8x1xf32, #tpu.memory_space<vmem>>, vector<1x8x1xf32>
      %28 = vector.shape_cast %27 : vector<1x8x1xf32> to vector<8x1xf32>
      %cst_16 = arith.constant dense<0xFF800000> : vector<8xf32>
      %29 = vector.multi_reduction <maximumf>, %26, %cst_16 [1] : vector<8x8xf32> to vector<8xf32>
      %30 = vector.shape_cast %29 : vector<8xf32> to vector<8x1xf32>
      %31 = arith.maximumf %28, %30 : vector<8x1xf32>
      %32 = arith.subf %28, %31 : vector<8x1xf32>
      %33 = math.exp %32 : vector<8x1xf32>
      %34 = vector.broadcast %31 : vector<8x1xf32> to vector<8x8xf32>
      %35 = arith.subf %26, %34 : vector<8x8xf32>
      %36 = arith.truncf %35 : vector<8x8xf32> to vector<8x8xbf16>
      %37 = math.exp %36 : vector<8x8xbf16>
      %c0_17 = arith.constant 0 : index
      %c0_18 = arith.constant 0 : index
      %c0_19 = arith.constant 0 : index
      %38 = vector.load %arg8[%c0_17, %c0_18, %c0_19] : memref<4x8x1xf32, #tpu.memory_space<vmem>>, vector<1x8x1xf32>
      %39 = vector.shape_cast %38 : vector<1x8x1xf32> to vector<8x1xf32>
      %40 = arith.mulf %33, %39 : vector<8x1xf32>
      %41 = arith.extf %37 : vector<8x8xbf16> to vector<8x8xf32>
      %cst_20 = arith.constant dense<0.000000e+00> : vector<8xf32>
      %42 = vector.multi_reduction <add>, %41, %cst_20 [1] : vector<8x8xf32> to vector<8xf32>
      %43 = vector.shape_cast %42 : vector<8xf32> to vector<8x1xf32>
      %44 = arith.addf %40, %43 : vector<8x1xf32>
      %c0_21 = arith.constant 0 : index
      %c0_22 = arith.constant 0 : index
      %c0_23 = arith.constant 0 : index
      %45 = vector.load %arg8[%c0_21, %c0_22, %c0_23] : memref<4x8x1xf32, #tpu.memory_space<vmem>>, vector<1x8x1xf32>
      %46 = vector.shape_cast %45 : vector<1x8x1xf32> to vector<8x1xf32>
      %47 = vector.shape_cast %44 : vector<8x1xf32> to vector<1x8x1xf32>
      tpu.vector_store %arg8[%c0_21, %c0_22, %c0_23], %47 {strides = array<i32>} : memref<4x8x1xf32, #tpu.memory_space<vmem>>, vector<1x8x1xf32>,
      %c0_24 = arith.constant 0 : index
      %c0_25 = arith.constant 0 : index
      %c0_26 = arith.constant 0 : index
      %48 = vector.load %arg9[%c0_24, %c0_25, %c0_26] : memref<4x8x32xf32, #tpu.memory_space<vmem>>, vector<1x8x32xf32>
      %49 = vector.shape_cast %48 : vector<1x8x32xf32> to vector<8x32xf32>
      %50 = vector.broadcast %33 : vector<8x1xf32> to vector<8x32xf32>
      %51 = arith.mulf %50, %49 : vector<8x32xf32>
      %cst_27 = arith.constant dense<0.000000e+00> : vector<8x32xf32>
      %52 = tpu.matmul %37, %23, %cst_27 {dimension_numbers = #tpu.dot_dimension_numbers<[1], [0], [0], [1], [0, 0, 1, 1], [], []>} : vector<8x8xbf16>, vector<8x32xbf16>, vector<8x32xf32> -> vector<8x32xf32>
      %53 = arith.addf %51, %52 : vector<8x32xf32>
      %c0_28 = arith.constant 0 : index
      %c0_29 = arith.constant 0 : index
      %c0_30 = arith.constant 0 : index
      %54 = vector.load %arg9[%c0_28, %c0_29, %c0_30] : memref<4x8x32xf32, #tpu.memory_space<vmem>>, vector<1x8x32xf32>
      %55 = vector.shape_cast %54 : vector<1x8x32xf32> to vector<8x32xf32>
      %56 = vector.shape_cast %53 : vector<8x32xf32> to vector<1x8x32xf32>
      tpu.vector_store %arg9[%c0_28, %c0_29, %c0_30], %56 {strides = array<i32>} : memref<4x8x32xf32, #tpu.memory_space<vmem>>, vector<1x8x32xf32>,
      %c0_31 = arith.constant 0 : index
      %c0_32 = arith.constant 0 : index
      %c0_33 = arith.constant 0 : index
      %57 = vector.load %arg7[%c0_31, %c0_32, %c0_33] : memref<4x8x1xf32, #tpu.memory_space<vmem>>, vector<1x8x1xf32>
      %58 = vector.shape_cast %57 : vector<1x8x1xf32> to vector<8x1xf32>
      %59 = vector.shape_cast %31 : vector<8x1xf32> to vector<1x8x1xf32>
      tpu.vector_store %arg7[%c0_31, %c0_32, %c0_33], %59 {strides = array<i32>} : memref<4x8x1xf32, #tpu.memory_space<vmem>>, vector<1x8x1xf32>,
      %c0_34 = arith.constant 0 : index
      %c0_35 = arith.constant 0 : index
      %c32 = arith.constant 32 : index
      %60 = vector.load %arg3[%c0_34, %c0_35, %c32] : memref<1x8x128xbf16, #tpu.memory_space<vmem>>, vector<1x8x32xbf16>
      %61 = vector.shape_cast %60 : vector<1x8x32xbf16> to vector<8x32xbf16>
      %c0_36 = arith.constant 0 : index
      %c0_37 = arith.constant 0 : index
      %c32_38 = arith.constant 32 : index
      %62 = vector.load %arg4[%c0_36, %c0_37, %c32_38] : memref<1x8x128xbf16, #tpu.memory_space<vmem>>, vector<1x8x32xbf16>
      %63 = vector.shape_cast %62 : vector<1x8x32xbf16> to vector<8x32xbf16>
      %c0_39 = arith.constant 0 : index
      %c0_40 = arith.constant 0 : index
      %c32_41 = arith.constant 32 : index
      %64 = vector.load %arg5[%c0_39, %c0_40, %c32_41] : memref<1x8x128xbf16, #tpu.memory_space<vmem>>, vector<1x8x32xbf16>
      %65 = vector.shape_cast %64 : vector<1x8x32xbf16> to vector<8x32xbf16>
      %cst_42 = arith.constant dense<0.000000e+00> : vector<8x8xf32>
      %66 = tpu.matmul %61, %63, %cst_42 {dimension_numbers = #tpu.dot_dimension_numbers<[1], [1], [0], [0], [0, 0, 1, 0], [], []>} : vector<8x32xbf16>, vector<8x32xbf16>, vector<8x8xf32> -> vector<8x8xf32>
      %cst_43 = arith.constant -1.000000e+04 : f32
      %67 = vector.broadcast %cst_43 : f32 to vector<8x8xf32>
      %68 = arith.select %17, %66, %67 : vector<8x8xi1>, vector<8x8xf32>
      %c1 = arith.constant 1 : index
      %c0_44 = arith.constant 0 : index
      %c0_45 = arith.constant 0 : index
      %69 = vector.load %arg7[%c1, %c0_44, %c0_45] : memref<4x8x1xf32, #tpu.memory_space<vmem>>, vector<1x8x1xf32>
      %70 = vector.shape_cast %69 : vector<1x8x1xf32> to vector<8x1xf32>
      %cst_46 = arith.constant dense<0xFF800000> : vector<8xf32>
      %71 = vector.multi_reduction <maximumf>, %68, %cst_46 [1] : vector<8x8xf32> to vector<8xf32>
      %72 = vector.shape_cast %71 : vector<8xf32> to vector<8x1xf32>
      %73 = arith.maximumf %70, %72 : vector<8x1xf32>
      %74 = arith.subf %70, %73 : vector<8x1xf32>
      %75 = math.exp %74 : vector<8x1xf32>
      %76 = vector.broadcast %73 : vector<8x1xf32> to vector<8x8xf32>
      %77 = arith.subf %68, %76 : vector<8x8xf32>
      %78 = arith.truncf %77 : vector<8x8xf32> to vector<8x8xbf16>
      %79 = math.exp %78 : vector<8x8xbf16>
      %c1_47 = arith.constant 1 : index
      %c0_48 = arith.constant 0 : index
      %c0_49 = arith.constant 0 : index
      %80 = vector.load %arg8[%c1_47, %c0_48, %c0_49] : memref<4x8x1xf32, #tpu.memory_space<vmem>>, vector<1x8x1xf32>
      %81 = vector.shape_cast %80 : vector<1x8x1xf32> to vector<8x1xf32>
      %82 = arith.mulf %75, %81 : vector<8x1xf32>
      %83 = arith.extf %79 : vector<8x8xbf16> to vector<8x8xf32>
      %cst_50 = arith.constant dense<0.000000e+00> : vector<8xf32>
      %84 = vector.multi_reduction <add>, %83, %cst_50 [1] : vector<8x8xf32> to vector<8xf32>
      %85 = vector.shape_cast %84 : vector<8xf32> to vector<8x1xf32>
      %86 = arith.addf %82, %85 : vector<8x1xf32>
      %c1_51 = arith.constant 1 : index
      %c0_52 = arith.constant 0 : index
      %c0_53 = arith.constant 0 : index
      %87 = vector.load %arg8[%c1_51, %c0_52, %c0_53] : memref<4x8x1xf32, #tpu.memory_space<vmem>>, vector<1x8x1xf32>
      %88 = vector.shape_cast %87 : vector<1x8x1xf32> to vector<8x1xf32>
      %89 = vector.shape_cast %86 : vector<8x1xf32> to vector<1x8x1xf32>
      tpu.vector_store %arg8[%c1_51, %c0_52, %c0_53], %89 {strides = array<i32>} : memref<4x8x1xf32, #tpu.memory_space<vmem>>, vector<1x8x1xf32>,
      %c1_54 = arith.constant 1 : index
      %c0_55 = arith.constant 0 : index
      %c0_56 = arith.constant 0 : index
      %90 = vector.load %arg9[%c1_54, %c0_55, %c0_56] : memref<4x8x32xf32, #tpu.memory_space<vmem>>, vector<1x8x32xf32>
      %91 = vector.shape_cast %90 : vector<1x8x32xf32> to vector<8x32xf32>
      %92 = vector.broadcast %75 : vector<8x1xf32> to vector<8x32xf32>
      %93 = arith.mulf %92, %91 : vector<8x32xf32>
      %cst_57 = arith.constant dense<0.000000e+00> : vector<8x32xf32>
      %94 = tpu.matmul %79, %65, %cst_57 {dimension_numbers = #tpu.dot_dimension_numbers<[1], [0], [0], [1], [0, 0, 1, 1], [], []>} : vector<8x8xbf16>, vector<8x32xbf16>, vector<8x32xf32> -> vector<8x32xf32>
      %95 = arith.addf %93, %94 : vector<8x32xf32>
      %c1_58 = arith.constant 1 : index
      %c0_59 = arith.constant 0 : index
      %c0_60 = arith.constant 0 : index
      %96 = vector.load %arg9[%c1_58, %c0_59, %c0_60] : memref<4x8x32xf32, #tpu.memory_space<vmem>>, vector<1x8x32xf32>
      %97 = vector.shape_cast %96 : vector<1x8x32xf32> to vector<8x32xf32>
      %98 = vector.shape_cast %95 : vector<8x32xf32> to vector<1x8x32xf32>
      tpu.vector_store %arg9[%c1_58, %c0_59, %c0_60], %98 {strides = array<i32>} : memref<4x8x32xf32, #tpu.memory_space<vmem>>, vector<1x8x32xf32>,
      %c1_61 = arith.constant 1 : index
      %c0_62 = arith.constant 0 : index
      %c0_63 = arith.constant 0 : index
      %99 = vector.load %arg7[%c1_61, %c0_62, %c0_63] : memref<4x8x1xf32, #tpu.memory_space<vmem>>, vector<1x8x1xf32>
      %100 = vector.shape_cast %99 : vector<1x8x1xf32> to vector<8x1xf32>
      %101 = vector.shape_cast %73 : vector<8x1xf32> to vector<1x8x1xf32>
      tpu.vector_store %arg7[%c1_61, %c0_62, %c0_63], %101 {strides = array<i32>} : memref<4x8x1xf32, #tpu.memory_space<vmem>>, vector<1x8x1xf32>,
      %c0_64 = arith.constant 0 : index
      %c0_65 = arith.constant 0 : index
      %c64 = arith.constant 64 : index
      %102 = vector.load %arg3[%c0_64, %c0_65, %c64] : memref<1x8x128xbf16, #tpu.memory_space<vmem>>, vector<1x8x32xbf16>
      %103 = vector.shape_cast %102 : vector<1x8x32xbf16> to vector<8x32xbf16>
      %c0_66 = arith.constant 0 : index
      %c0_67 = arith.constant 0 : index
      %c64_68 = arith.constant 64 : index
      %104 = vector.load %arg4[%c0_66, %c0_67, %c64_68] : memref<1x8x128xbf16, #tpu.memory_space<vmem>>, vector<1x8x32xbf16>
      %105 = vector.shape_cast %104 : vector<1x8x32xbf16> to vector<8x32xbf16>
      %c0_69 = arith.constant 0 : index
      %c0_70 = arith.constant 0 : index
      %c64_71 = arith.constant 64 : index
      %106 = vector.load %arg5[%c0_69, %c0_70, %c64_71] : memref<1x8x128xbf16, #tpu.memory_space<vmem>>, vector<1x8x32xbf16>
      %107 = vector.shape_cast %106 : vector<1x8x32xbf16> to vector<8x32xbf16>
      %cst_72 = arith.constant dense<0.000000e+00> : vector<8x8xf32>
      %108 = tpu.matmul %103, %105, %cst_72 {dimension_numbers = #tpu.dot_dimension_numbers<[1], [1], [0], [0], [0, 0, 1, 0], [], []>} : vector<8x32xbf16>, vector<8x32xbf16>, vector<8x8xf32> -> vector<8x8xf32>
      %cst_73 = arith.constant -1.000000e+04 : f32
      %109 = vector.broadcast %cst_73 : f32 to vector<8x8xf32>
      %110 = arith.select %17, %108, %109 : vector<8x8xi1>, vector<8x8xf32>
      %c2 = arith.constant 2 : index
      %c0_74 = arith.constant 0 : index
      %c0_75 = arith.constant 0 : index
      %111 = vector.load %arg7[%c2, %c0_74, %c0_75] : memref<4x8x1xf32, #tpu.memory_space<vmem>>, vector<1x8x1xf32>
      %112 = vector.shape_cast %111 : vector<1x8x1xf32> to vector<8x1xf32>
      %cst_76 = arith.constant dense<0xFF800000> : vector<8xf32>
      %113 = vector.multi_reduction <maximumf>, %110, %cst_76 [1] : vector<8x8xf32> to vector<8xf32>
      %114 = vector.shape_cast %113 : vector<8xf32> to vector<8x1xf32>
      %115 = arith.maximumf %112, %114 : vector<8x1xf32>
      %116 = arith.subf %112, %115 : vector<8x1xf32>
      %117 = math.exp %116 : vector<8x1xf32>
      %118 = vector.broadcast %115 : vector<8x1xf32> to vector<8x8xf32>
      %119 = arith.subf %110, %118 : vector<8x8xf32>
      %120 = arith.truncf %119 : vector<8x8xf32> to vector<8x8xbf16>
      %121 = math.exp %120 : vector<8x8xbf16>
      %c2_77 = arith.constant 2 : index
      %c0_78 = arith.constant 0 : index
      %c0_79 = arith.constant 0 : index
      %122 = vector.load %arg8[%c2_77, %c0_78, %c0_79] : memref<4x8x1xf32, #tpu.memory_space<vmem>>, vector<1x8x1xf32>
      %123 = vector.shape_cast %122 : vector<1x8x1xf32> to vector<8x1xf32>
      %124 = arith.mulf %117, %123 : vector<8x1xf32>
      %125 = arith.extf %121 : vector<8x8xbf16> to vector<8x8xf32>
      %cst_80 = arith.constant dense<0.000000e+00> : vector<8xf32>
      %126 = vector.multi_reduction <add>, %125, %cst_80 [1] : vector<8x8xf32> to vector<8xf32>
      %127 = vector.shape_cast %126 : vector<8xf32> to vector<8x1xf32>
      %128 = arith.addf %124, %127 : vector<8x1xf32>
      %c2_81 = arith.constant 2 : index
      %c0_82 = arith.constant 0 : index
      %c0_83 = arith.constant 0 : index
      %129 = vector.load %arg8[%c2_81, %c0_82, %c0_83] : memref<4x8x1xf32, #tpu.memory_space<vmem>>, vector<1x8x1xf32>
      %130 = vector.shape_cast %129 : vector<1x8x1xf32> to vector<8x1xf32>
      %131 = vector.shape_cast %128 : vector<8x1xf32> to vector<1x8x1xf32>
      tpu.vector_store %arg8[%c2_81, %c0_82, %c0_83], %131 {strides = array<i32>} : memref<4x8x1xf32, #tpu.memory_space<vmem>>, vector<1x8x1xf32>,
      %c2_84 = arith.constant 2 : index
      %c0_85 = arith.constant 0 : index
      %c0_86 = arith.constant 0 : index
      %132 = vector.load %arg9[%c2_84, %c0_85, %c0_86] : memref<4x8x32xf32, #tpu.memory_space<vmem>>, vector<1x8x32xf32>
      %133 = vector.shape_cast %132 : vector<1x8x32xf32> to vector<8x32xf32>
      %134 = vector.broadcast %117 : vector<8x1xf32> to vector<8x32xf32>
      %135 = arith.mulf %134, %133 : vector<8x32xf32>
      %cst_87 = arith.constant dense<0.000000e+00> : vector<8x32xf32>
      %136 = tpu.matmul %121, %107, %cst_87 {dimension_numbers = #tpu.dot_dimension_numbers<[1], [0], [0], [1], [0, 0, 1, 1], [], []>} : vector<8x8xbf16>, vector<8x32xbf16>, vector<8x32xf32> -> vector<8x32xf32>
      %137 = arith.addf %135, %136 : vector<8x32xf32>
      %c2_88 = arith.constant 2 : index
      %c0_89 = arith.constant 0 : index
      %c0_90 = arith.constant 0 : index
      %138 = vector.load %arg9[%c2_88, %c0_89, %c0_90] : memref<4x8x32xf32, #tpu.memory_space<vmem>>, vector<1x8x32xf32>
      %139 = vector.shape_cast %138 : vector<1x8x32xf32> to vector<8x32xf32>
      %140 = vector.shape_cast %137 : vector<8x32xf32> to vector<1x8x32xf32>
      tpu.vector_store %arg9[%c2_88, %c0_89, %c0_90], %140 {strides = array<i32>} : memref<4x8x32xf32, #tpu.memory_space<vmem>>, vector<1x8x32xf32>,
      %c2_91 = arith.constant 2 : index
      %c0_92 = arith.constant 0 : index
      %c0_93 = arith.constant 0 : index
      %141 = vector.load %arg7[%c2_91, %c0_92, %c0_93] : memref<4x8x1xf32, #tpu.memory_space<vmem>>, vector<1x8x1xf32>
      %142 = vector.shape_cast %141 : vector<1x8x1xf32> to vector<8x1xf32>
      %143 = vector.shape_cast %115 : vector<8x1xf32> to vector<1x8x1xf32>
      tpu.vector_store %arg7[%c2_91, %c0_92, %c0_93], %143 {strides = array<i32>} : memref<4x8x1xf32, #tpu.memory_space<vmem>>, vector<1x8x1xf32>,
      %c0_94 = arith.constant 0 : index
      %c0_95 = arith.constant 0 : index
      %c96 = arith.constant 96 : index
      %144 = vector.load %arg3[%c0_94, %c0_95, %c96] : memref<1x8x128xbf16, #tpu.memory_space<vmem>>, vector<1x8x32xbf16>
      %145 = vector.shape_cast %144 : vector<1x8x32xbf16> to vector<8x32xbf16>
      %c0_96 = arith.constant 0 : index
      %c0_97 = arith.constant 0 : index
      %c96_98 = arith.constant 96 : index
      %146 = vector.load %arg4[%c0_96, %c0_97, %c96_98] : memref<1x8x128xbf16, #tpu.memory_space<vmem>>, vector<1x8x32xbf16>
      %147 = vector.shape_cast %146 : vector<1x8x32xbf16> to vector<8x32xbf16>
      %c0_99 = arith.constant 0 : index
      %c0_100 = arith.constant 0 : index
      %c96_101 = arith.constant 96 : index
      %148 = vector.load %arg5[%c0_99, %c0_100, %c96_101] : memref<1x8x128xbf16, #tpu.memory_space<vmem>>, vector<1x8x32xbf16>
      %149 = vector.shape_cast %148 : vector<1x8x32xbf16> to vector<8x32xbf16>
      %cst_102 = arith.constant dense<0.000000e+00> : vector<8x8xf32>
      %150 = tpu.matmul %145, %147, %cst_102 {dimension_numbers = #tpu.dot_dimension_numbers<[1], [1], [0], [0], [0, 0, 1, 0], [], []>} : vector<8x32xbf16>, vector<8x32xbf16>, vector<8x8xf32> -> vector<8x8xf32>
      %cst_103 = arith.constant -1.000000e+04 : f32
      %151 = vector.broadcast %cst_103 : f32 to vector<8x8xf32>
      %152 = arith.select %17, %150, %151 : vector<8x8xi1>, vector<8x8xf32>
      %c3 = arith.constant 3 : index
      %c0_104 = arith.constant 0 : index
      %c0_105 = arith.constant 0 : index
      %153 = vector.load %arg7[%c3, %c0_104, %c0_105] : memref<4x8x1xf32, #tpu.memory_space<vmem>>, vector<1x8x1xf32>
      %154 = vector.shape_cast %153 : vector<1x8x1xf32> to vector<8x1xf32>
      %cst_106 = arith.constant dense<0xFF800000> : vector<8xf32>
      %155 = vector.multi_reduction <maximumf>, %152, %cst_106 [1] : vector<8x8xf32> to vector<8xf32>
      %156 = vector.shape_cast %155 : vector<8xf32> to vector<8x1xf32>
      %157 = arith.maximumf %154, %156 : vector<8x1xf32>
      %158 = arith.subf %154, %157 : vector<8x1xf32>
      %159 = math.exp %158 : vector<8x1xf32>
      %160 = vector.broadcast %157 : vector<8x1xf32> to vector<8x8xf32>
      %161 = arith.subf %152, %160 : vector<8x8xf32>
      %162 = arith.truncf %161 : vector<8x8xf32> to vector<8x8xbf16>
      %163 = math.exp %162 : vector<8x8xbf16>
      %c3_107 = arith.constant 3 : index
      %c0_108 = arith.constant 0 : index
      %c0_109 = arith.constant 0 : index
      %164 = vector.load %arg8[%c3_107, %c0_108, %c0_109] : memref<4x8x1xf32, #tpu.memory_space<vmem>>, vector<1x8x1xf32>
      %165 = vector.shape_cast %164 : vector<1x8x1xf32> to vector<8x1xf32>
      %166 = arith.mulf %159, %165 : vector<8x1xf32>
      %167 = arith.extf %163 : vector<8x8xbf16> to vector<8x8xf32>
      %cst_110 = arith.constant dense<0.000000e+00> : vector<8xf32>
      %168 = vector.multi_reduction <add>, %167, %cst_110 [1] : vector<8x8xf32> to vector<8xf32>
      %169 = vector.shape_cast %168 : vector<8xf32> to vector<8x1xf32>
      %170 = arith.addf %166, %169 : vector<8x1xf32>
      %c3_111 = arith.constant 3 : index
      %c0_112 = arith.constant 0 : index
      %c0_113 = arith.constant 0 : index
      %171 = vector.load %arg8[%c3_111, %c0_112, %c0_113] : memref<4x8x1xf32, #tpu.memory_space<vmem>>, vector<1x8x1xf32>
      %172 = vector.shape_cast %171 : vector<1x8x1xf32> to vector<8x1xf32>
      %173 = vector.shape_cast %170 : vector<8x1xf32> to vector<1x8x1xf32>
      tpu.vector_store %arg8[%c3_111, %c0_112, %c0_113], %173 {strides = array<i32>} : memref<4x8x1xf32, #tpu.memory_space<vmem>>, vector<1x8x1xf32>,
      %c3_114 = arith.constant 3 : index
      %c0_115 = arith.constant 0 : index
      %c0_116 = arith.constant 0 : index
      %174 = vector.load %arg9[%c3_114, %c0_115, %c0_116] : memref<4x8x32xf32, #tpu.memory_space<vmem>>, vector<1x8x32xf32>
      %175 = vector.shape_cast %174 : vector<1x8x32xf32> to vector<8x32xf32>
      %176 = vector.broadcast %159 : vector<8x1xf32> to vector<8x32xf32>
      %177 = arith.mulf %176, %175 : vector<8x32xf32>
      %cst_117 = arith.constant dense<0.000000e+00> : vector<8x32xf32>
      %178 = tpu.matmul %163, %149, %cst_117 {dimension_numbers = #tpu.dot_dimension_numbers<[1], [0], [0], [1], [0, 0, 1, 1], [], []>} : vector<8x8xbf16>, vector<8x32xbf16>, vector<8x32xf32> -> vector<8x32xf32>
      %179 = arith.addf %177, %178 : vector<8x32xf32>
      %c3_118 = arith.constant 3 : index
      %c0_119 = arith.constant 0 : index
      %c0_120 = arith.constant 0 : index
      %180 = vector.load %arg9[%c3_118, %c0_119, %c0_120] : memref<4x8x32xf32, #tpu.memory_space<vmem>>, vector<1x8x32xf32>
      %181 = vector.shape_cast %180 : vector<1x8x32xf32> to vector<8x32xf32>
      %182 = vector.shape_cast %179 : vector<8x32xf32> to vector<1x8x32xf32>
      tpu.vector_store %arg9[%c3_118, %c0_119, %c0_120], %182 {strides = array<i32>} : memref<4x8x32xf32, #tpu.memory_space<vmem>>, vector<1x8x32xf32>,
      %c3_121 = arith.constant 3 : index
      %c0_122 = arith.constant 0 : index
      %c0_123 = arith.constant 0 : index
      %183 = vector.load %arg7[%c3_121, %c0_122, %c0_123] : memref<4x8x1xf32, #tpu.memory_space<vmem>>, vector<1x8x1xf32>
      %184 = vector.shape_cast %183 : vector<1x8x1xf32> to vector<8x1xf32>
      %185 = vector.shape_cast %157 : vector<8x1xf32> to vector<1x8x1xf32>
      tpu.vector_store %arg7[%c3_121, %c0_122, %c0_123], %185 {strides = array<i32>} : memref<4x8x1xf32, #tpu.memory_space<vmem>>, vector<1x8x1xf32>,
      %c0_124 = arith.constant 0 : index
      %c0_125 = arith.constant 0 : index
      %c0_126 = arith.constant 0 : index
      %186 = vector.load %arg8[%c0_124, %c0_125, %c0_126] : memref<4x8x1xf32, #tpu.memory_space<vmem>>, vector<1x8x1xf32>
      %187 = vector.shape_cast %186 : vector<1x8x1xf32> to vector<8x1xf32>
      %188 = tpu.reciprocal %187 : vector<8x1xf32> -> vector<8x1xf32>
      %c0_127 = arith.constant 0 : index
      %c0_128 = arith.constant 0 : index
      %c0_129 = arith.constant 0 : index
      %189 = vector.load %arg9[%c0_127, %c0_128, %c0_129] : memref<4x8x32xf32, #tpu.memory_space<vmem>>, vector<1x8x32xf32>
      %190 = vector.shape_cast %189 : vector<1x8x32xf32> to vector<8x32xf32>
      %191 = vector.broadcast %188 : vector<8x1xf32> to vector<8x32xf32>
      %192 = arith.mulf %190, %191 : vector<8x32xf32>
      %193 = arith.truncf %192 : vector<8x32xf32> to vector<8x32xbf16>
      %c0_130 = arith.constant 0 : index
      %c0_131 = arith.constant 0 : index
      %c0_132 = arith.constant 0 : index
      %194 = vector.load %arg6[%c0_130, %c0_131, %c0_132] : memref<1x8x128xbf16, #tpu.memory_space<vmem>>, vector<1x8x32xbf16>
      %195 = vector.shape_cast %194 : vector<1x8x32xbf16> to vector<8x32xbf16>
      %196 = vector.shape_cast %193 : vector<8x32xbf16> to vector<1x8x32xbf16>
      tpu.vector_store %arg6[%c0_130, %c0_131, %c0_132], %196 {strides = array<i32>} : memref<1x8x128xbf16, #tpu.memory_space<vmem>>, vector<1x8x32xbf16>,
      %c1_133 = arith.constant 1 : index
      %c0_134 = arith.constant 0 : index
      %c0_135 = arith.constant 0 : index
      %197 = vector.load %arg8[%c1_133, %c0_134, %c0_135] : memref<4x8x1xf32, #tpu.memory_space<vmem>>, vector<1x8x1xf32>
      %198 = vector.shape_cast %197 : vector<1x8x1xf32> to vector<8x1xf32>
      %199 = tpu.reciprocal %198 : vector<8x1xf32> -> vector<8x1xf32>
      %c1_136 = arith.constant 1 : index
      %c0_137 = arith.constant 0 : index
      %c0_138 = arith.constant 0 : index
      %200 = vector.load %arg9[%c1_136, %c0_137, %c0_138] : memref<4x8x32xf32, #tpu.memory_space<vmem>>, vector<1x8x32xf32>
      %201 = vector.shape_cast %200 : vector<1x8x32xf32> to vector<8x32xf32>
      %202 = vector.broadcast %199 : vector<8x1xf32> to vector<8x32xf32>
      %203 = arith.mulf %201, %202 : vector<8x32xf32>
      %204 = arith.truncf %203 : vector<8x32xf32> to vector<8x32xbf16>
      %c0_139 = arith.constant 0 : index
      %c0_140 = arith.constant 0 : index
      %c32_141 = arith.constant 32 : index
      %205 = vector.load %arg6[%c0_139, %c0_140, %c32_141] : memref<1x8x128xbf16, #tpu.memory_space<vmem>>, vector<1x8x32xbf16>
      %206 = vector.shape_cast %205 : vector<1x8x32xbf16> to vector<8x32xbf16>
      %207 = vector.shape_cast %204 : vector<8x32xbf16> to vector<1x8x32xbf16>
      tpu.vector_store %arg6[%c0_139, %c0_140, %c32_141], %207 {strides = array<i32>} : memref<1x8x128xbf16, #tpu.memory_space<vmem>>, vector<1x8x32xbf16>,
      %c2_142 = arith.constant 2 : index
      %c0_143 = arith.constant 0 : index
      %c0_144 = arith.constant 0 : index
      %208 = vector.load %arg8[%c2_142, %c0_143, %c0_144] : memref<4x8x1xf32, #tpu.memory_space<vmem>>, vector<1x8x1xf32>
      %209 = vector.shape_cast %208 : vector<1x8x1xf32> to vector<8x1xf32>
      %210 = tpu.reciprocal %209 : vector<8x1xf32> -> vector<8x1xf32>
      %c2_145 = arith.constant 2 : index
      %c0_146 = arith.constant 0 : index
      %c0_147 = arith.constant 0 : index
      %211 = vector.load %arg9[%c2_145, %c0_146, %c0_147] : memref<4x8x32xf32, #tpu.memory_space<vmem>>, vector<1x8x32xf32>
      %212 = vector.shape_cast %211 : vector<1x8x32xf32> to vector<8x32xf32>
      %213 = vector.broadcast %210 : vector<8x1xf32> to vector<8x32xf32>
      %214 = arith.mulf %212, %213 : vector<8x32xf32>
      %215 = arith.truncf %214 : vector<8x32xf32> to vector<8x32xbf16>
      %c0_148 = arith.constant 0 : index
      %c0_149 = arith.constant 0 : index
      %c64_150 = arith.constant 64 : index
      %216 = vector.load %arg6[%c0_148, %c0_149, %c64_150] : memref<1x8x128xbf16, #tpu.memory_space<vmem>>, vector<1x8x32xbf16>
      %217 = vector.shape_cast %216 : vector<1x8x32xbf16> to vector<8x32xbf16>
      %218 = vector.shape_cast %215 : vector<8x32xbf16> to vector<1x8x32xbf16>
      tpu.vector_store %arg6[%c0_148, %c0_149, %c64_150], %218 {strides = array<i32>} : memref<1x8x128xbf16, #tpu.memory_space<vmem>>, vector<1x8x32xbf16>,
      %c3_151 = arith.constant 3 : index
      %c0_152 = arith.constant 0 : index
      %c0_153 = arith.constant 0 : index
      %219 = vector.load %arg8[%c3_151, %c0_152, %c0_153] : memref<4x8x1xf32, #tpu.memory_space<vmem>>, vector<1x8x1xf32>
      %220 = vector.shape_cast %219 : vector<1x8x1xf32> to vector<8x1xf32>
      %221 = tpu.reciprocal %220 : vector<8x1xf32> -> vector<8x1xf32>
      %c3_154 = arith.constant 3 : index
      %c0_155 = arith.constant 0 : index
      %c0_156 = arith.constant 0 : index
      %222 = vector.load %arg9[%c3_154, %c0_155, %c0_156] : memref<4x8x32xf32, #tpu.memory_space<vmem>>, vector<1x8x32xf32>
      %223 = vector.shape_cast %222 : vector<1x8x32xf32> to vector<8x32xf32>
      %224 = vector.broadcast %221 : vector<8x1xf32> to vector<8x32xf32>
      %225 = arith.mulf %223, %224 : vector<8x32xf32>
      %226 = arith.truncf %225 : vector<8x32xf32> to vector<8x32xbf16>
      %c0_157 = arith.constant 0 : index
      %c0_158 = arith.constant 0 : index
      %c96_159 = arith.constant 96 : index
      %227 = vector.load %arg6[%c0_157, %c0_158, %c96_159] : memref<1x8x128xbf16, #tpu.memory_space<vmem>>, vector<1x8x32xbf16>
      %228 = vector.shape_cast %227 : vector<1x8x32xbf16> to vector<8x32xbf16>
      %229 = vector.shape_cast %226 : vector<8x32xbf16> to vector<1x8x32xbf16>
      tpu.vector_store %arg6[%c0_157, %c0_158, %c96_159], %229 {strides = array<i32>} : memref<1x8x128xbf16, #tpu.memory_space<vmem>>, vector<1x8x32xbf16>,
    } else {
    }
    return
  }
  func.func @transform_0(%arg0: i32, %arg1: i32, %arg2: i32) -> (i32, i32, i32) {
    %c0_i32 = arith.constant 0 : i32
    %c0_i32_0 = arith.constant 0 : i32
    return %arg0, %arg1, %c0_i32 : i32, i32, i32
  }
  func.func @transform_1(%arg0: i32, %arg1: i32, %arg2: i32) -> (i32, i32, i32) {
    %0 = arith.minsi %arg2, %arg1 : i32
    %c1_i32 = arith.constant 1 : i32
    %c0_i32 = arith.constant 0 : i32
    return %arg0, %0, %c1_i32 : i32, i32, i32
  }
  func.func @transform_2(%arg0: i32, %arg1: i32, %arg2: i32) -> (i32, i32, i32) {
    %0 = arith.minsi %arg2, %arg1 : i32
    %c2_i32 = arith.constant 2 : i32
    %c0_i32 = arith.constant 0 : i32
    return %arg0, %0, %c2_i32 : i32, i32, i32
  }
  func.func @transform_3(%arg0: i32, %arg1: i32, %arg2: i32) -> (i32, i32, i32) {
    %c0_i32 = arith.constant 0 : i32
    %c0_i32_0 = arith.constant 0 : i32
    return %arg0, %arg1, %c0_i32 : i32, i32, i32
  }
}

</mosaic_0001>

<bundles_post_ra>
// kernel: mul.9
= control target key start
LH: loop header
LB: loop body
LE: loop exit
PB: predicated region body
PF: predicated region fallthrough
CT: control target
= control target key end

     0   :  { %3 = vsyncpa [#allocation1], 0  ;;  %s50_s11 = smov [#allocation0]   ;;  %s75_s0 = inlined_call_operand.hbm [shape: f32[384], index: 0, kind: input, shape index: {}]   ;;  %s76_s1 = inlined_call_operand.vmem [shape: f32[384], index: 1, kind: input, shape index: {}]   ;;  %s77_s2 = inlined_call_operand.vmem [shape: f32[384], index: 2, kind: output, shape index: {}]  }
   0x1   :  { %s7_s0 = sshll.u32 %s75_s0, 4  ;;  %s9_s12 = sshll.u32 %s50_s11, 4  ;;  %s8_s0 = int_to_ptr.hbm [resolvable:$true] %s7_s0  ;;  %s10_s12 = int_to_ptr.vmem [resolvable:$true] %s9_s12 }
   0x2   :  { %12 = dma.hbm_to_vmem [thread:$0]  %s8_s0, 64, %s10_s12, [#allocation1]  }
   0x3   :  { %48 = dma.done.wait [#allocation1], 64  }
   0x4   :  { %49 = vsyncadd [#allocation1], 4294967232  ;;  %v15_v0 = vld [vmem:[#allocation0] sm:$0x7] }
   0x5   :  { %v16_v1 = vld [vmem:[%s76_s1] sm:$0x7] }
   0x6   :  { %v19_v2 = vmul.f32 %v16_v1, %v15_v0 }
   0x8   :  { %21 = vst [vmem:[%s77_s2] sm:$0xf] %v19_v2 }
   0x9   :  { %22 = vsyncpa [#allocation1], 1 }

// kernel: attention_forward.5
= control target key start
LH: loop header
LB: loop body
LE: loop exit
PB: predicated region body
PF: predicated region fallthrough
CT: control target
= control target key end

     0   :  { %s200_s0 = inlined_call_operand.vmem [shape: bf16[16,128], index: 0, kind: input, shape index: {}]   ;;  %s201_s1 = inlined_call_operand.vmem [shape: f32[128,128], index: 1, kind: input, shape index: {}]   ;;  %s202_s2 = inlined_call_operand.vmem [shape: f32[1,128], index: 2, kind: input, shape index: {}]   ;;  %s203_s3 = inlined_call_operand.hbm [shape: f32[16,128], index: 3, kind: output, shape index: {}]  }
   0x1   :  { %v31_v0 = vld [vmem:[%s201_s1 + $0x70] sm:$0xff]  ;;  %v32_v1 = vld [vmem:[%s201_s1 + $0x78] sm:$0xff]  ;;  %v29_v2 = vld [vmem:[%s201_s1 + $0x60] sm:$0xff] }
   0x2   :  { %v40_v3 = vpack.c.bf16 %v32_v1, %v31_v0  ;;  %v30_v4 = vld [vmem:[%s201_s1 + $0x68] sm:$0xff]  ;;  %v27_v6 = vld [vmem:[%s201_s1 + $0x50] sm:$0xff]  ;;  %v28_v7 = vld [vmem:[%s201_s1 + $0x58] sm:$0xff] }
   0x3   :  { %v39_v5 = vpack.c.bf16 %v30_v4, %v29_v2 }
   0x4   :  { %51 = vmatpush.bf16.msra.mxu0 %v40_v3 }
   0x5   :  { %8 = vsyncpa [#allocation3], 0  ;;  %v38_v8 = vpack.c.bf16 %v28_v7, %v27_v6  ;;  %v25_v9 = vld [vmem:[%s201_s1 + $0x40] sm:$0xff]  ;;  %v26_v10 = vld [vmem:[%s201_s1 + $0x48] sm:$0xff]  ;;  %s120_s21 = smov [#allocation2]   ;;  %s122_s25 = smov 8  }
   0x6   :  { %v37_v11 = vpack.c.bf16 %v26_v10, %v25_v9  ;;  %v23_v12 = vld [vmem:[%s201_s1 + $0x30] sm:$0xff]  ;;  %v24_v13 = vld [vmem:[%s201_s1 + $0x38] sm:$0xff]  ;;  %v21_v15 = vld [vmem:[%s201_s1 + $0x20] sm:$0xff]  ;;  %s71_s22 = sshll.u32 %s120_s21, 4  ;;  %s72_s22 = int_to_ptr.vmem [resolvable:$true] %s71_s22 }
   0x7   :  { %v36_v14 = vpack.c.bf16 %v24_v13, %v23_v12  ;;  %v22_v16 = vld [vmem:[%s201_s1 + $0x28] sm:$0xff]  ;;  %v19_v18 = vld [vmem:[%s201_s1 + $0x10] sm:$0xff]  ;;  %v20_v19 = vld [vmem:[%s201_s1 + $0x18] sm:$0xff] }
   0x8   :  { %52 = vmatpush.bf16.msra.mxu0 %v39_v5  ;;  %v35_v17 = vpack.c.bf16 %v22_v16, %v21_v15  ;;  %v34_v20 = vpack.c.bf16 %v20_v19, %v19_v18  ;;  %v17_v21 = vld [vmem:[%s201_s1] sm:$0xff]  ;;  %v18_v22 = vld [vmem:[%s201_s1 + $0x8] sm:$0xff]  ;;  %s73_s1 = sshll.u32 %s203_s3, 4  ;;  %s74_s1 = int_to_ptr.hbm [resolvable:$true] %s73_s1 }
   0x9   :  { %v33_v23 = vpack.c.bf16 %v18_v22, %v17_v21  ;;  %v89_v24 = vld [vmem:[%s200_s0] sm:$0xff]  ;;  %s121_s0 = smov 128  }
   0xa   :  { %v93_v25 = vld [vmem:[%s202_s2] ss:$0 sm:$0xff] }
   0xc   :  { %53 = vmatpush.bf16.msra.mxu0 %v38_v8 }
  0x10   :  { %54 = vmatpush.bf16.msra.mxu0 %v37_v11 }
  0x14   :  { %55 = vmatpush.bf16.msra.mxu0 %v36_v14 }
  0x18   :  { %56 = vmatpush.bf16.msra.mxu0 %v35_v17 }
  0x1c   :  { %57 = vmatpush.bf16.msra.mxu0 %v34_v20 }
  0x20   :  { %58 = vmatpush.bf16.msra.mxu0 %v33_v23 }
  0x23   :  { %59 = vmatmul.bf16.vlgmr.msra.gmra.mxu0 %v89_v24 }
  0xa0   :  { %v60_v26 = vpop.f32.mrf.mxu0 }
  0xa1   :  { %v61_v27 = vadd.f32 %v93_v25, %v60_v26 }
  0xa3   :  { %65 = vst [vmem:[#allocation2] sm:$0xff] %v61_v27 }
  0xa8   :  { %v62_v28 = vpop.f32.mrf.mxu0 }
  0xa9   :  { %v63_v29 = vadd.f32 %v93_v25, %v62_v28 }
  0xab   :  { %66 = vst [vmem:[#allocation2 + $0x8] sm:$0xff] %v63_v29 }
  0xac   :  { %79 = dma.vmem_to_hbm [thread:$0]  %s72_s22, 256, %s74_s1, [#allocation3], %s121_s0, %s121_s0, %s122_s25  }
  0xad   :  { %118 = dma.done.wait [#allocation3], 256  }
  0xae   :  { %119 = vsyncadd [#allocation3], 4294967040 }
  0xaf   :  { %84 = vsyncpa [#allocation3], 1 }

// kernel: attention_forward.3
= control target key start
LH: loop header
LB: loop body
LE: loop exit
PB: predicated region body
PF: predicated region fallthrough
CT: control target
= control target key end

     0   :  { %s628_s12 = smov 0   ;;  %s630_s13 = smov 0   ;;  %s754_s0 = inlined_call_operand.vmem [shape: f32[16,128], index: 0, kind: input, shape index: {}]   ;;  %s755_s1 = inlined_call_operand.vmem [shape: f32[128,384], index: 1, kind: input, shape index: {}]   ;;  %s756_s2 = inlined_call_operand.vmem [shape: f32[1,384], index: 2, kind: input, shape index: {}]   ;;  %s757_s3 = inlined_call_operand.vmem [shape: bf16[16,384], index: 3, kind: output, shape index: {}]  }
   0x1   :  { %s632_s14 = smov 0   ;;  %s634_s15 = smov 0  }
   0x2   :  { %s636_s16 = smov 0  }
   0x3 LB: > { %s25_s17 = sadd.s32 1, %s602_s15  ;;  %s508_s18 = sadd.s32 4294967295, %s606_s16   ;;  %s606_s16 = sphi %s636_s16, %s13_s16   ;;  %s602_s15 = sphi %s634_s15, %s762_s15   ;;  %s598_s14 = sphi %s632_s14, %s761_s14   ;;  %s594_s13 = sphi %s630_s13, %s760_s13   ;;  %s590_s12 = sphi %s628_s12, %s759_s12  }
   0x4   : > { %p27_p0 = scmp.ge.s32.totalorder %s25_s17, 3  ;;  %p65_p1 = scmp.ne.s32.totalorder %s594_s13, %s590_s12 }
   0x5   : > { %p66_p2 = scmp.eq.s32.totalorder %s606_s16, 0  ;;  %p123_p4 = scmp.eq.s32.totalorder %s508_s18, 2 }
   0x6   : > { %s764_s17 = smov (%p27_p0, %s25_s17), 0  ;;  %s58_s20 = sadd.s32 1, %s594_s13 }
   0x7   : > { %p67_p3 = por %p66_p2, %p65_p1  ;;  %s55_s19 = ssub.s32 %s602_s15, %s764_s17 }
   0x8   : > { %p56_p5 = scmp.eq.s32.totalorder %s55_s19, 0  ;;  %p663_p6 = por %p123_p4, %p65_p1 }
   0x9   : > { %p512_p7 = scmp.ge.s32.totalorder %s606_s16, 3 }
   0xa   : > { %s668_s22 = scalar_select %p56_p5, %s594_s13, %s58_s20  }
   0xb   : > { %154 = sbr.rel (%p512_p7) target bundleno = 36 (0x24), region = 20 }
  0x10   : > { %157 = sbr.rel (!%p67_p3) target bundleno = 36 (0x24), region = 24  ;;  %s159_s23 = sand.u32 (%p67_p3), 1, %s594_s13  }
  0x11   : > { %s514_s24 = sshll.u32 (%p67_p3), %s602_s15, 3  ;;  %s513_s25 = sshll.u32 (%p67_p3), %s159_s23, 7 }
  0x12   : > { %s676_s28 = scalar_lea.vmem (%p67_p3), %s755_s1, %s514_s24  ;;  %s161_s29 = scalar_lea.vmem (%p67_p3), [#allocation2], %s513_s25 }
  0x13   : > { %v222_v0 = vld [vmem:[%s676_s28] sm:$0xff] (%p67_p3)  ;;  %v224_v1 = vld [vmem:[%s676_s28 + $0x18] sm:$0xff] (%p67_p3)  ;;  %v226_v2 = vld [vmem:[%s676_s28 + $0x30] sm:$0xff] (%p67_p3) }
  0x14   : > { %223 = vst [vmem:[%s161_s29] sm:$0xff] (%p67_p3), %v222_v0  ;;  %v228_v3 = vld [vmem:[%s676_s28 + $0x48] sm:$0xff] (%p67_p3)  ;;  %v230_v4 = vld [vmem:[%s676_s28 + $0x60] sm:$0xff] (%p67_p3)  ;;  %v232_v5 = vld [vmem:[%s676_s28 + $0x78] sm:$0xff] (%p67_p3) }
  0x15   : > { %225 = vst [vmem:[%s161_s29 + $0x8] sm:$0xff] %v224_v1  ;;  %v234_v6 = vld [vmem:[%s676_s28 + $0x90] sm:$0xff]  ;;  %v236_v7 = vld [vmem:[%s676_s28 + $0xa8] sm:$0xff]  ;;  %v238_v8 = vld [vmem:[%s676_s28 + $0xc0] sm:$0xff] }
  0x16   : > { %227 = vst [vmem:[%s161_s29 + $0x10] sm:$0xff] %v226_v2  ;;  %v240_v9 = vld [vmem:[%s676_s28 + $0xd8] sm:$0xff]  ;;  %v242_v10 = vld [vmem:[%s676_s28 + $0xf0] sm:$0xff]  ;;  %v244_v11 = vld [vmem:[%s676_s28 + $0x108] sm:$0xff] }
  0x17   : > { %229 = vst [vmem:[%s161_s29 + $0x18] sm:$0xff] %v228_v3  ;;  %v246_v12 = vld [vmem:[%s676_s28 + $0x120] sm:$0xff]  ;;  %v248_v13 = vld [vmem:[%s676_s28 + $0x138] sm:$0xff]  ;;  %v250_v14 = vld [vmem:[%s676_s28 + $0x150] sm:$0xff] }
  0x18   : > { %231 = vst [vmem:[%s161_s29 + $0x20] sm:$0xff] %v230_v4  ;;  %v252_v15 = vld [vmem:[%s676_s28 + $0x168] sm:$0xff] }
  0x19   : > { %233 = vst [vmem:[%s161_s29 + $0x28] sm:$0xff] %v232_v5 }
  0x1a   : > { %235 = vst [vmem:[%s161_s29 + $0x30] sm:$0xff] %v234_v6 }
  0x1b   : > { %237 = vst [vmem:[%s161_s29 + $0x38] sm:$0xff] %v236_v7 }
  0x1c   : > { %239 = vst [vmem:[%s161_s29 + $0x40] sm:$0xff] %v238_v8 }
  0x1d   : > { %241 = vst [vmem:[%s161_s29 + $0x48] sm:$0xff] %v240_v9 }
  0x1e   : > { %243 = vst [vmem:[%s161_s29 + $0x50] sm:$0xff] %v242_v10 }
  0x1f   : > { %245 = vst [vmem:[%s161_s29 + $0x58] sm:$0xff] %v244_v11 }
  0x20   : > { %247 = vst [vmem:[%s161_s29 + $0x60] sm:$0xff] %v246_v12 }
  0x21   : > { %249 = vst [vmem:[%s161_s29 + $0x68] sm:$0xff] %v248_v13 }
  0x22   : > { %251 = vst [vmem:[%s161_s29 + $0x70] sm:$0xff] %v250_v14 }
  0x23   : > { %253 = vst [vmem:[%s161_s29 + $0x78] sm:$0xff] %v252_v15 }
  0x24 PF: > { %p515_p8 = scmp.ge.s32.totalorder %s606_s16, 1  ;;  %p264_p9 = scmp.lt.s32.totalorder %s606_s16, 4 }
  0x26   : > { %p265_p10 = pnand %p515_p8, %p264_p9 }
  0x27   : > { %s271_s30 = sand.u32 (!%p265_p10), 1, %s590_s12   ;;  %p307_p11 = scmp.lt.s32.totalorder (!%p265_p10), %s598_s14, 2 }
  0x28   : > { %268 = sbr.rel (%p265_p10) target bundleno = 227 (0xe3), region = 66  ;;  %s516_s4 = sshll.u32 (!%p265_p10), %s271_s30, 7 }
  0x29   : > { %s700_s5 = scalar_lea.vmem (!%p265_p10), [#allocation2], %s516_s4  ;;  %s517_s20 = sshll.u32 (!%p265_p10), %s271_s30, 3 }
  0x2a   : > { %s300_s23 = scalar_lea.vmem (!%p265_p10), [#allocation3], %s517_s20 }
  0x2d   : > { %v328_v16 = vld [vmem:[%s700_s5 + $0x70] sm:$0xff]  ;;  %v329_v17 = vld [vmem:[%s700_s5 + $0x78] sm:$0xff]  ;;  %v326_v18 = vld [vmem:[%s700_s5 + $0x60] sm:$0xff]  ;;  %s706_s6 = scalar_select %p307_p11, %s598_s14, 2 }
  0x2e   : > { %v337_v19 = vpack.c.bf16 %v329_v17, %v328_v16  ;;  %v327_v20 = vld [vmem:[%s700_s5 + $0x68] sm:$0xff]  ;;  %v324_v22 = vld [vmem:[%s700_s5 + $0x50] sm:$0xff]  ;;  %v325_v23 = vld [vmem:[%s700_s5 + $0x58] sm:$0xff]  ;;  %s519_s24 = sshll.u32 (%p663_p6), %s598_s14, 2 }
  0x2f   : > { %v336_v21 = vpack.c.bf16 %v327_v20, %v326_v18  ;;  %s309_s9 = scalar_lea.vmem %s756_s2, %s706_s6  ;;  %v335_v24 = vpack.c.bf16 %v325_v23, %v324_v22  ;;  %v322_v25 = vld [vmem:[%s700_s5 + $0x40] sm:$0xff]  ;;  %v323_v26 = vld [vmem:[%s700_s5 + $0x48] sm:$0xff]  ;;  %v320_v28 = vld [vmem:[%s700_s5 + $0x30] sm:$0xff]  ;;  %s371_s27 = scalar_lea.vmem (%p663_p6), %s757_s3, %s519_s24 }
  0x30   : > { %342 = vmatpush.bf16.msra.mxu0 %v337_v19  ;;  %v334_v27 = vpack.c.bf16 %v323_v26, %v322_v25  ;;  %v321_v29 = vld [vmem:[%s700_s5 + $0x38] sm:$0xff]  ;;  %v318_v31 = vld [vmem:[%s700_s5 + $0x20] sm:$0xff]  ;;  %v319_v32 = vld [vmem:[%s700_s5 + $0x28] sm:$0xff] }
  0x31   : > { %v333_v30 = vpack.c.bf16 %v321_v29, %v320_v28  ;;  %v332_v33 = vpack.c.bf16 %v319_v32, %v318_v31  ;;  %v316_v34 = vld [vmem:[%s700_s5 + $0x10] sm:$0xff]  ;;  %v317_v35 = vld [vmem:[%s700_s5 + $0x18] sm:$0xff]  ;;  %v314_v37 = vld [vmem:[%s700_s5] sm:$0xff] }
  0x32   : > { %v331_v36 = vpack.c.bf16 %v317_v35, %v316_v34  ;;  %v315_v38 = vld [vmem:[%s700_s5 + $0x8] sm:$0xff]  ;;  %v311_v40 = vld [vmem:[%s754_s0] sm:$0xff] }
  0x33   : > { %v330_v39 = vpack.c.bf16 %v315_v38, %v314_v37  ;;  %v312_v41 = vld [vmem:[%s754_s0 + $0x8] sm:$0xff]  ;;  %v567_v44 = vld [vmem:[%s309_s9] ss:$0 sm:$0xff] }
  0x34   : > { %343 = vmatpush.bf16.msra.mxu0 %v336_v21  ;;  %v313_v42 = vpack.c.bf16 %v312_v41, %v311_v40 }
  0x38   : > { %344 = vmatpush.bf16.msra.mxu0 %v335_v24 }
  0x3c   : > { %345 = vmatpush.bf16.msra.mxu0 %v334_v27 }
  0x40   : > { %346 = vmatpush.bf16.msra.mxu0 %v333_v30 }
  0x44   : > { %347 = vmatpush.bf16.msra.mxu0 %v332_v33 }
  0x48   : > { %348 = vmatpush.bf16.msra.mxu0 %v331_v36 }
  0x4c   : > { %349 = vmatpush.bf16.msra.mxu0 %v330_v39 }
  0x4f   : > { %350 = vmatmul.bf16.vlgmr.msra.gmra.mxu0 %v313_v42 }
  0xcc   : > { %v351_v43 = vpop.f32.mrf.mxu0 }
  0xcd   : > { %v352_v46 = vadd.f32 %v567_v44, %v351_v43 }
  0xd4   : > { %v353_v45 = vpop.f32.mrf.mxu0 }
  0xd5   : > { %v354_v47 = vadd.f32 %v567_v44, %v353_v45  ;;  %366 = sbr.rel (!%p663_p6) target bundleno = 227 (0xe3), region = 74 }
  0xd7   : > { %v525_v48 = vpack.c.bf16 %v354_v47, %v352_v46 }
  0xd9   : > { %526 = vst [vmem:[%s300_s23] sm:$0xff] %v525_v48  }
  0xe0   : > { %v388_v49 = vld [vmem:[%s300_s23] sm:$0xf]  ;;  %v390_v50 = vld [vmem:[%s300_s23 + $0x4] sm:$0xf] }
  0xe1   : > { %389 = vst [vmem:[%s371_s27] sm:$0xf] %v388_v49 }
  0xe2   : > { %391 = vst [vmem:[%s371_s27 + $0xc] sm:$0xf] %v390_v50 }
  0xe3 PF: > { %s13_s16 = sadd.s32 1, %s606_s16   ;;  %s759_s12 = smov %s594_s13 }
  0xe4   : > { %p10_p12 = scmp.ge.s32.totalorder %s13_s16, 5   ;;  %s760_s13 = smov %s668_s22 }
  0xe5   : > { %s761_s14 = smov %s602_s15  ;;  %s762_s15 = smov %s764_s17 }
  0xe6   :  { %12 = sbr.rel (!%p10_p12) target bundleno = 3 (0x3), region = 152 }

// kernel: attention_forward.4
= control target key start
LH: loop header
LB: loop body
LE: loop exit
PB: predicated region body
PF: predicated region fallthrough
CT: control target
= control target key end

     0   :  { %s1488_s12 = smov 0   ;;  %s1490_s13 = smov 0   ;;  %s1662_s0 = inlined_call_operand.vmem [shape: bf16[2,8,384], index: 0, kind: input, shape index: {}, may-alias: {0,1,2}]   ;;  %s1663_s1 = inlined_call_operand.vmem [shape: bf16[2,8,384], index: 1, kind: input, shape index: {}, may-alias: {0,1,2}]   ;;  %s1664_s2 = inlined_call_operand.vmem [shape: bf16[2,8,384], index: 2, kind: input, shape index: {}, may-alias: {0,1,2}]   ;;  %s1665_s3 = inlined_call_operand.vmem [shape: bf16[2,8,128], index: 3, kind: output, shape index: {}]  }
   0x1   :  { %s1492_s14 = smov 0  }
   0x2 LB: > { %s32_s15 = sadd.s32 1, %s1456_s13  ;;  %p1341_p0 = scmp.ge.s32.totalorder %s1460_s14, 1  ;;  %s1460_s14 = sphi %s1492_s14, %s13_s14   ;;  %s1456_s13 = sphi %s1490_s13, %s1667_s13   ;;  %s1452_s12 = sphi %s1488_s12, %s1666_s12  }
   0x3   : > { %p34_p1 = scmp.ge.s32.totalorder %s32_s15, 2  ;;  %p214_p2 = scmp.lt.s32.totalorder %s1460_s14, 3 }
   0x5   : > { %s1669_s15 = smov (%p34_p1, %s32_s15), 0  ;;  %p215_p3 = pnand %p1341_p0, %p214_p2 }
   0x6   : > { %p268_p4 = scmp.lt.s32.totalorder (!%p215_p3), %s1452_s12, 1  ;;  %s1462_s23 = smov (!%p215_p3), 96  }
   0x7   : > { %218 = sbr.rel (%p215_p3) target bundleno = 1172 (0x494), region = 32  ;;  %s1463_s24 = smov (!%p215_p3), 64  }
   0x8   : > { %s1464_s25 = smov (!%p215_p3), 32  }
   0xc   : > { %s1671_s12 = smov (!%p268_p4, %s1452_s12), 1  ;;  %vm326_vm0 = vcmask 261120   ;;  %vm317_vm1 = vcmask 7168   ;;  %v1465_v19 = vmov -inf   ;;  %v710_v24 = vlaneseq }
   0xd   : > { %s1509_s16 = smul.u32 12, %s1671_s12  ;;  %318 = vst.msk [vmem:[#allocation2] sm:$0xff] %vm317_vm1, %v1465_v19  ;;  %vm745_vm3 = vcmask 64512   ;;  %v1466_v33 = vmov 0   ;;  %v1467_v34 = vmov 0.0   ;;  %vm783_vm4 = vcmask 1043456  }
   0xe   : > { %319 = vst.msk [vmem:[#allocation2 + $0x8] sm:$0xff] %vm317_vm1, %v1465_v19  ;;  %v1538_v27 = vshrl.u32 %v710_v24, 7  ;;  %v1540_v28 = vand.u32 127, %v710_v24  ;;  %1411 = vset.pattern.permute.xlu0 %v1466_v33  ;;  %1412 = vset.pattern.permute.xlu2 %v1466_v33  ;;  %s1345_s29 = sshll.u32 %s1671_s12, 2  ;;  %vm1117_vm14 = vcmask 257024  }
   0xf   : > { %s1277_s19 = scalar_lea.vmem %s1663_s1, %s1509_s16  ;;  %s1520_s22 = scalar_lea.vmem %s1662_s0, %s1509_s16  ;;  %320 = vst.msk [vmem:[#allocation2 + $0x10] sm:$0xff] %vm317_vm1, %v1465_v19  ;;  %1413 = vset.pattern.permute.xlu1 %v1466_v33 }
  0x10   : > { %v1362_v0 = vld [vmem:[%s1277_s19 + $0x4] sm:$0xf]  ;;  %v803_v6 = vld [vmem:[%s1520_s22] sm:$0xf]  ;;  %321 = vst.msk [vmem:[#allocation2 + $0x18] sm:$0xff] %vm317_vm1, %v1465_v19  ;;  %vm719_vm2 = vcmp.ge.s32.totalorder %v1538_v27, %v1540_v28  ;;  %s1571_s28 = scalar_lea.vmem %s1664_s2, %s1509_s16  ;;  %s1644_s5 = scalar_lea.vmem %s1665_s3, %s1345_s29 }
  0x11   : > { %v1366_v1 = vld [vmem:[%s1277_s19 + $0x4] sm:$0xf]  ;;  %v728_v2 = vsel %vm326_vm0, %v1362_v0, 0  ;;  %v807_v10 = vunpack.c.l.b16 %v803_v6  ;;  %v720_v11 = vld [vmem:[%s1520_s22] sm:$0xf]  ;;  %322 = vst.msk [vmem:[#allocation3] sm:$0xff] %vm317_vm1, %v1467_v34 }
  0x12   : > { %v812_v3 = vunpack.c.l.b16 %v1366_v1  ;;  %v1370_v4 = vld [vmem:[%s1277_s19 + $0x4] sm:$0xf]  ;;  %737 = vmatpush.bf16.xpose.msra.mxu0 %v728_v2  ;;  %v997_v15 = vld [vmem:[%s1520_s22] sm:$0xf]  ;;  %323 = vst.msk [vmem:[#allocation3 + $0x8] sm:$0xff] %vm317_vm1, %v1467_v34 }
  0x13   : > { %v909_v5 = vunpack.c.l.b16 %v1370_v4  ;;  %v1374_v8 = vld [vmem:[%s1277_s19 + $0x4] sm:$0xf]  ;;  %v808_v13 = vpack.c.b16 %v807_v10, %v807_v10  ;;  %v1001_v16 = vunpack.c.l.b16 %v997_v15  ;;  %v900_v35 = vld [vmem:[%s1520_s22] sm:$0xf]  ;;  %324 = vst.msk [vmem:[#allocation3 + $0x10] sm:$0xff] %vm317_vm1, %v1467_v34 }
  0x14   : > { %v813_v7 = vpack.c.b16 %v812_v3, %v812_v3  ;;  %v1006_v12 = vunpack.c.l.b16 %v1374_v8  ;;  %v904_v36 = vunpack.c.l.b16 %v900_v35  ;;  %325 = vst.msk [vmem:[#allocation3 + $0x18] sm:$0xff] %vm317_vm1, %v1467_v34  ;;  %v744_v38 = vld [vmem:[#allocation2] sm:$0xff]  ;;  %v1363_v48 = vld [vmem:[%s1571_s28 + $0x8] sm:$0xf] }
  0x15   : > { %v910_v9 = vpack.c.b16 %v909_v5, %v909_v5  ;;  %v1002_v17 = vpack.c.b16 %v1001_v16, %v1001_v16  ;;  %327 = vst.msk [vmem:[#allocation4] sm:$0xff] %vm326_vm0, %v1467_v34  ;;  %v785_v50 = vsel %vm783_vm4, %v1363_v48, 0  ;;  %v1367_v51 = vld [vmem:[%s1571_s28 + $0x8] sm:$0xf] }
  0x16   : > { %814 = vrot.lane.b32.xlu1 %v813_v7, %s1462_s23  ;;  %v1007_v14 = vpack.c.b16 %v1006_v12, %v1006_v12  ;;  %v905_v37 = vpack.c.b16 %v904_v36, %v904_v36  ;;  %328 = vst.msk [vmem:[#allocation4 + $0x8] sm:$0xff] %vm326_vm0, %v1467_v34  ;;  %794 = vmatpush.bf16.msra.mxu1 %v785_v50  ;;  %v874_v53 = vunpack.c.l.b16 %v1367_v51  ;;  %v1371_v56 = vld [vmem:[%s1571_s28 + $0x8] sm:$0xf] }
  0x17   : > { %911 = vrot.lane.b32.xlu2 %v910_v9, %s1463_s24  ;;  %329 = vst.msk [vmem:[#allocation4 + $0x10] sm:$0xff] %vm326_vm0, %v1467_v34  ;;  %v971_v57 = vunpack.c.l.b16 %v1371_v56  ;;  %v837_v4 = vld [vmem:[#allocation2 + $0x8] sm:$0xff]  ;;  %v1031_v8 = vld [vmem:[#allocation2 + $0x18] sm:$0xff] }
  0x18   : > { %330 = vst.msk [vmem:[#allocation4 + $0x18] sm:$0xff] %vm326_vm0, %v1467_v34  ;;  %v875_v55 = vpack.c.b16 %v874_v53, %v874_v53  ;;  %v764_v16 = vld [vmem:[#allocation3] sm:$0xff] }
  0x19   : > { %1364 = vmatmul.msk.bf16.vlgmr.msra.gmra.mxu0 %vm326_vm0, %v720_v11  ;;  %v972_v58 = vpack.c.b16 %v971_v57, %v971_v57 }
  0x1b   : > { %v1051_v53 = vld [vmem:[#allocation3 + $0x18] sm:$0xff] }
  0x1e   : > { %809 = vrot.lane.b32.xlu1 %v808_v13, %s1462_s23 }
  0x1f   : > { %1008 = vrot.lane.b32.xlu2 %v1007_v14, %s1464_s25 }
  0x26   : > { %906 = vrot.lane.b32.xlu1 %v905_v37, %s1463_s24 }
  0x27   : > { %1003 = vrot.lane.b32.xlu2 %v1002_v17, %s1464_s25 }
  0x71   : > { %v912_v18 = vpop.permute.xlu2 %911 }
  0x72   : > { %v917_v49 = vsel %vm326_vm0, %v912_v18, 0 }
  0x73   : > { %926 = vmatpush.bf16.xpose.msrb.mxu1 %v917_v49 }
  0x79   : > { %v1009_v20 = vpop.permute.xlu2 %1008 }
  0x7a   : > { %v1014_v21 = vsel %vm326_vm0, %v1009_v20, 0 }
  0x7b   : > { %1023 = vmatpush.bf16.xpose.msrb.mxu0 %v1014_v21 }
  0x81   : > { %v1004_v25 = vpop.permute.xlu2 %1003 }
  0x82   : > { %1376 = vmatmul.msk.bf16.vlgmr.msrb.gmra.mxu0 %vm326_vm0, %v1004_v25 }
  0x88   : > { %v815_v22 = vpop.permute.xlu1 %814 }
  0x89   : > { %v820_v23 = vsel %vm326_vm0, %v815_v22, 0 }
  0x8a   : > { %829 = vmatpush.bf16.xpose.msra.mxu2 %v820_v23 }
  0x90   : > { %v810_v26 = vpop.permute.xlu1 %809 }
  0x91   : > { %1368 = vmatmul.msk.bf16.vlgmr.msra.gmra.mxu2 %vm326_vm0, %v810_v26 }
  0x96   : > { %v739_v29 = vpop.f32.mrf.mxu0 }
  0x97   : > { %v743_v30 = vsel %vm719_vm2, %v739_v29, -10000.0 }
  0x98   : > { %v746_v31 = vsel %vm745_vm3, %v743_v30, -inf  ;;  %v907_v0 = vpop.permute.xlu1 %906 }
  0x99   : > { %747 = vmax.xlane.f32.xlu0 %v746_v31 }
  0x9e   : > { %v741_v32 = vpop.f32.mrf.mxu0 }
  0xff   : > { %v1025_v40 = vpop.f32.mrf.mxu0 }
 0x100   : > { %v1029_v52 = vsel %vm719_vm2, %v1025_v40, -10000.0 }
 0x101   : > { %v1032_v54 = vsel %vm745_vm3, %v1029_v52, -inf }
 0x107   : > { %v1027_v43 = vpop.f32.mrf.mxu0 }
 0x10c   : > { %v748_v39 = vpop.xlane.xlu0 %747 }
 0x10d   : > { %v749_v41 = vmax.f32 %v744_v38, %v748_v39  ;;  %v934_v39 = vld [vmem:[#allocation2 + $0x10] sm:$0xff] }
 0x10f   : > { %v750_v42 = vsub.f32 %v744_v38, %v749_v41  ;;  %802 = vst.msk [vmem:[#allocation2] sm:$0xff] %vm317_vm1, %v749_v41  ;;  %755 = vperm.xlu0 %1411, %v749_v41   ;;  %v1375_v41 = vld [vmem:[%s1571_s28 + $0x8] sm:$0xf] }
 0x110   : > { %v1068_v43 = vunpack.c.l.b16 %v1375_v41 }
 0x111   : > { %v751_v13 = vmul.f32 1.442695, %v750_v42 }
 0x114   : > { %v831_v44 = vpop.f32.mrf.mxu2 }
 0x115   : > { %v1563_v45 = vsel %vm719_vm2, %v831_v44, -10000.0 }
 0x116   : > { %v838_v46 = vsel %vm745_vm3, %v1563_v45, -inf }
 0x117   : > { %839 = vmax.xlane.f32.xlu1 %v838_v46  ;;  %v1069_v46 = vpack.c.b16 %v1068_v43, %v1068_v43 }
 0x11c   : > { %v833_v47 = vpop.f32.mrf.mxu2 }
 0x130   : > { %876 = vrot.lane.b32.xlu1 %v875_v55, %s1462_s23 }
 0x138   : > { %973 = vrot.lane.b32.xlu1 %v972_v58, %s1463_s24 }
 0x139   : > { %1033 = vmax.xlane.f32.xlu0 %v1032_v54 }
 0x181   : > { %v756_v59 = vpop.permute.xlu0 %755 }
 0x182   : > { %v758_v60 = vsub.f32 %v743_v30, %v756_v59 }
 0x184   : > { %v759_v61 = vpack.c.bf16 %v758_v60, %v758_v60 }
 0x186   : > { %v760_v62 = vunpack.c.l.bf16 %v759_v61 }
 0x188   : > { %v761_v63 = vmul.f32 1.442695, %v760_v62 }
 0x18a   : > { %1414 = vpow2.f32 %v761_v63  ;;  %v840_v6 = vpop.xlane.xlu1 %839 }
 0x18b   : > { %v841_v7 = vmax.f32 %v837_v4, %v840_v6  ;;  %1416 = vpow2.f32 %v751_v13 }
 0x18d   : > { %899 = vst.msk [vmem:[#allocation2 + $0x8] sm:$0xff] %vm317_vm1, %v841_v7  ;;  %v842_v28 = vsub.f32 %v837_v4, %v841_v7 }
 0x18f   : > { %v843_v36 = vmul.f32 1.442695, %v842_v28 }
 0x190   : > { %v1415_v1 = vpop.eup %1414 }
 0x191   : > { %v763_v2 = vpack.c.bf16 %v1415_v1, %v1415_v1  ;;  %v1591_v15 = vpop.eup %1416 }
 0x192   : > { %v765_v17 = vmul.f32 %v1591_v15, %v764_v16 }
 0x193   : > { %1365 = vmatmul.msk.bf16.vlgmr.msra.gmra.mxu1 %vm745_vm3, %v763_v2  ;;  %v766_v3 = vunpack.c.l.bf16 %v763_v2 }
 0x195   : > { %v767_v5 = vsel %vm745_vm3, %v766_v3, 0.0 }
 0x196   : > { %768 = vadd.xlane.f32.xlu1 %v767_v5 }
 0x1a2   : > { %v877_v12 = vpop.permute.xlu1 %876 }
 0x1a3   : > { %1372 = vmatmul.msk.bf16.vlgmr.msrb.gmra.mxu1 %vm326_vm0, %v907_v0  ;;  %v882_v38 = vsel %vm783_vm4, %v877_v12, 0 }
 0x1a4   : > { %891 = vmatpush.bf16.msra.mxu3 %v882_v38 }
 0x1aa   : > { %v1589_v14 = vpop.permute.xlu1 %973 }
 0x1ac   : > { %v1034_v9 = vpop.xlane.xlu0 %1033 }
 0x1ad   : > { %v1035_v10 = vmax.f32 %v1031_v8, %v1034_v9 }
 0x1af   : > { %v1036_v11 = vsub.f32 %v1031_v8, %v1035_v10  ;;  %1093 = vst.msk [vmem:[#allocation2 + $0x18] sm:$0xff] %vm317_vm1, %v1035_v10  ;;  %1041 = vperm.xlu0 %1411, %v1035_v10   ;;  %v979_v10 = vsel %vm783_vm4, %v1589_v14, 0 }
 0x1b0   : > { %988 = vmatpush.bf16.msrb.mxu3 %v979_v10 }
 0x1b1   : > { %v1037_v44 = vmul.f32 1.442695, %v1036_v11 }
 0x209   : > { %v769_v18 = vpop.xlane.xlu1 %768 }
 0x20a   : > { %v770_v19 = vadd.f32 %v769_v18, %v765_v17 }
 0x20c   : > { %772 = vst.msk [vmem:[#allocation3] sm:$0xff] %vm317_vm1, %v770_v19 }
 0x210   : > { %v1595_v20 = vpop.f32.mrf.mxu1 }
 0x213   : > { %v1094_v59 = vld [vmem:[#allocation3] sm:$0xff] }
 0x214   : > { %v1106_v5 = vand.u32 2147483648, %v1094_v59  ;;  %vm1100_vm6 = vweird.f32 %v1094_v59  ;;  %v1104_v6 = vand.u32 2147483647, %v1094_v59 }
 0x216   : > { %v1107_v8 = vor.u32 1.1754944e-38, %v1106_v5  ;;  %vm1105_vm8 = vcmp.eq.f32.partialorder %v1104_v6, 8.507059e+37 }
 0x218   : > { %v798_v21 = vpop.f32.mrf.mxu1 }
 0x220   : > { %v928_v22 = vpop.f32.mrf.mxu1 }
 0x221   : > { %v1600_v23 = vsel %vm719_vm2, %v928_v22, -10000.0  ;;  %v1042_v24 = vpop.permute.xlu0 %1041 }
 0x222   : > { %v1044_v25 = vsub.f32 %v1029_v52, %v1042_v24  ;;  %v935_v26 = vsel %vm745_vm3, %v1600_v23, -inf }
 0x223   : > { %936 = vmax.xlane.f32.xlu2 %v935_v26 }
 0x224   : > { %v1045_v29 = vpack.c.bf16 %v1044_v25, %v1044_v25 }
 0x226   : > { %v1046_v30 = vunpack.c.l.bf16 %v1045_v29 }
 0x228   : > { %v1047_v31 = vmul.f32 1.442695, %v1046_v30  ;;  %v930_v32 = vpop.f32.mrf.mxu1  ;;  %v866_v30 = vld [vmem:[#allocation4 + $0x8] sm:$0xff] }
 0x22a   : > { %1418 = vpow2.f32 %v1047_v31 }
 0x22b   : > { %1420 = vpow2.f32 %v843_v36 }
 0x22c   : > { %1422 = vpow2.f32 %v1037_v44  ;;  %v954_v44 = vld [vmem:[#allocation3 + $0x10] sm:$0xff] }
 0x230   : > { %v1419_v33 = vpop.eup %1418 }
 0x231   : > { %v1604_v34 = vpack.c.bf16 %v1419_v33, %v1419_v33  ;;  %v1608_v37 = vpop.eup %1420 }
 0x232   : > { %v1423_v51 = vpop.eup %1422 }
 0x233   : > { %v1053_v35 = vunpack.c.l.bf16 %v1604_v34  ;;  %v1052_v54 = vmul.f32 %v1423_v51, %v1051_v53 }
 0x235   : > { %v1054_v27 = vsel %vm745_vm3, %v1053_v35, 0.0 }
 0x236   : > { %1055 = vadd.xlane.f32.xlu1 %v1054_v27 }
 0x23b   : > { %847 = vperm.xlu2 %1412, %v841_v7  }
 0x24f   : > { %869 = vperm.xlu1 %1413, %v1608_v37  }
 0x296   : > { %v937_v40 = vpop.xlane.xlu2 %936 }
 0x297   : > { %v938_v42 = vmax.f32 %v934_v39, %v937_v40 }
 0x299   : > { %996 = vst.msk [vmem:[#allocation2 + $0x10] sm:$0xff] %vm317_vm1, %v938_v42  ;;  %944 = vperm.xlu2 %1412, %v938_v42   ;;  %v939_v62 = vsub.f32 %v934_v39, %v938_v42 }
 0x29b   : > { %v940_v0 = vmul.f32 1.442695, %v939_v62 }
 0x29e   : > { %v848_v47 = vpop.permute.xlu2 %847 }
 0x29f   : > { %v850_v48 = vsub.f32 %v1563_v45, %v848_v47 }
 0x2a1   : > { %v851_v49 = vpack.c.bf16 %v850_v48, %v850_v48  ;;  %1070 = vrot.lane.b32.xlu2 %v1069_v46, %s1464_s25 }
 0x2a3   : > { %v852_v50 = vunpack.c.l.bf16 %v851_v49  ;;  %v773_v49 = vld [vmem:[#allocation4] sm:$0xff] }
 0x2a5   : > { %v853_v52 = vmul.f32 1.442695, %v852_v50 }
 0x2a7   : > { %1424 = vpow2.f32 %v853_v52  ;;  %v963_v52 = vld [vmem:[#allocation4 + $0x10] sm:$0xff] }
 0x2a8   : > { %1426 = vrcp.f32 %v1094_v59 }
 0x2a9   : > { %v1056_v55 = vpop.xlane.xlu1 %1055  ;;  %1428 = vpow2.f32 %v940_v0 }
 0x2aa   : > { %v1057_v56 = vadd.f32 %v1056_v55, %v1052_v54 }
 0x2ac   : > { %1058 = vst.msk [vmem:[#allocation3 + $0x18] sm:$0xff] %vm317_vm1, %v1057_v56 }
 0x2ad   : > { %v1425_v57 = vpop.eup %1424 }
 0x2ae   : > { %v855_v58 = vpack.c.bf16 %v1425_v57, %v1425_v57  ;;  %v1427_v61 = vpop.eup %1426 }
 0x2af   : > { %v1096_v63 = vmul.f32 %v1427_v61, %v1094_v59  ;;  %v1619_v3 = vpop.eup %1428  ;;  %vm1101_vm5 = vweird.f32 %v1427_v61 }
 0x2b0   : > { %1369 = vmatmul.msk.bf16.vlgmr.msra.gmra.mxu3 %vm745_vm3, %v855_v58  ;;  %v859_v60 = vunpack.c.l.bf16 %v855_v58  ;;  %vm1102_vm7 = vmor %vm1100_vm6, %vm1101_vm5  ;;  %v955_v46 = vmul.f32 %v1619_v3, %v954_v44  ;;  %vm1146_vm6 = vcmask 519424  }
 0x2b1   : > { %v1097_v1 = vsub.f32 1.0, %v1096_v63 }
 0x2b2   : > { %v860_v45 = vsel %vm745_vm3, %v859_v60, 0.0  ;;  %v1060_v60 = vld [vmem:[#allocation4 + $0x18] sm:$0xff] }
 0x2b3   : > { %861 = vadd.xlane.f32.xlu0 %v860_v45  ;;  %v1098_v2 = vmul.f32 %v1427_v61, %v1097_v1 }
 0x2b5   : > { %v1099_v4 = vadd.f32 %v1427_v61, %v1098_v2 }
 0x2b7   : > { %v1103_v7 = vsel %vm1102_vm7, %v1427_v61, %v1099_v4  ;;  %vm1175_vm7 = vcmask 781824  }
 0x2b8   : > { %v1108_v9 = vsel %vm1105_vm8, %v1107_v8, %v1103_v7  ;;  %vm1204_vm8 = vcmask 1044224  }
 0x2c1   : > { %v870_v31 = vpop.permute.xlu1 %869 }
 0x2c2   : > { %v872_v33 = vmul.f32 %v870_v31, %v866_v30 }
 0x2c7   : > { %966 = vperm.xlu0 %1411, %v1619_v3  }
 0x2cf   : > { %1112 = vperm.xlu0 %1411, %v1108_v9  }
 0x2f3   : > { %v945_v11 = vpop.permute.xlu2 %944 }
 0x2f4   : > { %v947_v12 = vsub.f32 %v1600_v23, %v945_v11  ;;  %v857_v23 = vld [vmem:[#allocation3 + $0x8] sm:$0xff] }
 0x2f5   : > { %v858_v25 = vmul.f32 %v1608_v37, %v857_v23 }
 0x2f6   : > { %v948_v13 = vpack.c.bf16 %v947_v12, %v947_v12 }
 0x2f8   : > { %v949_v16 = vunpack.c.l.bf16 %v948_v13 }
 0x2fa   : > { %v950_v17 = vmul.f32 1.442695, %v949_v16  ;;  %v1177_v16 = vld [vmem:[#allocation3 + $0x18] sm:$0xff] }
 0x2fb   : > { %v1071_v18 = vpop.permute.xlu2 %1070 }
 0x2fc   : > { %1430 = vpow2.f32 %v950_v17  ;;  %v1076_v19 = vsel %vm783_vm4, %v1071_v18, 0 }
 0x2fd   : > { %1085 = vmatpush.bf16.msrb.mxu2 %v1076_v19 }
 0x300   : > { %1377 = vmatmul.msk.bf16.vlgmr.msrb.gmra.mxu2 %vm745_vm3, %v1604_v34 }
 0x302   : > { %v1431_v21 = vpop.eup %1430 }
 0x303   : > { %v952_v22 = vpack.c.bf16 %v1431_v21, %v1431_v21 }
 0x305   : > { %1373 = vmatmul.msk.bf16.vlgmr.msrb.gmra.mxu3 %vm745_vm3, %v952_v22  ;;  %v956_v14 = vunpack.c.l.bf16 %v952_v22 }
 0x307   : > { %v957_v24 = vsel %vm745_vm3, %v956_v14, 0.0  ;;  %vm1183_vm3 = vweird.f32 %v1177_v16 }
 0x308   : > { %958 = vadd.xlane.f32.xlu2 %v957_v24 }
 0x320   : > { %776 = vperm.xlu2 %1412, %v1591_v15  }
 0x326   : > { %v862_v26 = vpop.xlane.xlu0 %861 }
 0x327   : > { %v863_v29 = vadd.f32 %v862_v26, %v858_v25  ;;  %v1189_v26 = vand.u32 2147483648, %v1177_v16 }
 0x328   : > { %1063 = vperm.xlu2 %1412, %v1423_v51  }
 0x329   : > { %864 = vst.msk [vmem:[#allocation3 + $0x8] sm:$0xff] %vm317_vm1, %v863_v29  ;;  %v1187_v29 = vand.u32 2147483647, %v1177_v16  ;;  %v1190_v31 = vor.u32 1.1754944e-38, %v1189_v26 }
 0x32b   : > { %vm1188_vm5 = vcmp.eq.f32.partialorder %v1187_v29, 8.507059e+37 }
 0x330   : > { %v1119_v32 = vld [vmem:[#allocation3 + $0x8] sm:$0xff] }
 0x331   : > { %1432 = vrcp.f32 %v1119_v32  ;;  %v1131_v38 = vand.u32 2147483648, %v1119_v32  ;;  %v1129_v39 = vand.u32 2147483647, %v1119_v32  ;;  %vm1125_vm10 = vweird.f32 %v1119_v32 }
 0x333   : > { %v893_v34 = vpop.f32.mrf.mxu3  ;;  %v1132_v41 = vor.u32 1.1754944e-38, %v1131_v38  ;;  %vm1130_vm12 = vcmp.eq.f32.partialorder %v1129_v39, 8.507059e+37 }
 0x334   : > { %v897_v35 = vadd.f32 %v893_v34, %v872_v33 }
 0x336   : > { %898 = vst.msk [vmem:[#allocation4 + $0x8] sm:$0xff] %vm326_vm0, %v897_v35 }
 0x337   : > { %v1433_v27 = vpop.eup %1432 }
 0x338   : > { %v1121_v28 = vmul.f32 %v1433_v27, %v1119_v32  ;;  %vm1126_vm9 = vweird.f32 %v1433_v27 }
 0x339   : > { %vm1127_vm11 = vmor %vm1125_vm10, %vm1126_vm9  ;;  %v967_v53 = vpop.permute.xlu0 %966 }
 0x33a   : > { %v1122_v15 = vsub.f32 1.0, %v1121_v28  ;;  %v969_v57 = vmul.f32 %v967_v53, %v963_v52 }
 0x33b   : > { %v895_v36 = vpop.f32.mrf.mxu3 }
 0x33c   : > { %v1123_v37 = vmul.f32 %v1433_v27, %v1122_v15 }
 0x33d   : > { %v1134_v21 = vld [vmem:[#allocation4 + $0x8] sm:$0xff] }
 0x33e   : > { %v1124_v40 = vadd.f32 %v1433_v27, %v1123_v37 }
 0x340   : > { %v1128_v42 = vsel %vm1127_vm11, %v1433_v27, %v1124_v40 }
 0x341   : > { %v1133_v43 = vsel %vm1130_vm12, %v1132_v41, %v1128_v42  ;;  %v1113_v2 = vpop.permute.xlu0 %1112 }
 0x342   : > { %1137 = vperm.xlu1 %1413, %v1133_v43  }
 0x37b   : > { %v959_v47 = vpop.xlane.xlu2 %958 }
 0x37c   : > { %v960_v48 = vadd.f32 %v959_v47, %v955_v46 }
 0x37e   : > { %961 = vst.msk [vmem:[#allocation3 + $0x10] sm:$0xff] %vm317_vm1, %v960_v48 }
 0x383   : > { %v777_v50 = vpop.permute.xlu2 %776  ;;  %v1087_v51 = vpop.f32.mrf.mxu2 }
 0x384   : > { %v779_v54 = vmul.f32 %v777_v50, %v773_v49 }
 0x385   : > { %v1148_v55 = vld [vmem:[#allocation3 + $0x10] sm:$0xff] }
 0x386   : > { %v800_v56 = vadd.f32 %v1595_v20, %v779_v54  ;;  %1434 = vrcp.f32 %v1148_v55  ;;  %v1160_v5 = vand.u32 2147483648, %v1148_v55  ;;  %v1158_v8 = vand.u32 2147483647, %v1148_v55 }
 0x387   : > { %vm1154_vm15 = vweird.f32 %v1148_v55  ;;  %1436 = vrcp.f32 %v1177_v16 }
 0x388   : > { %801 = vst.msk [vmem:[#allocation4] sm:$0xff] %vm326_vm0, %v800_v56  ;;  %v990_v58 = vpop.f32.mrf.mxu3  ;;  %v1161_v11 = vor.u32 1.1754944e-38, %v1160_v5 }
 0x389   : > { %v994_v59 = vadd.f32 %v990_v58, %v969_v57 }
 0x38b   : > { %995 = vst.msk [vmem:[#allocation4 + $0x10] sm:$0xff] %vm326_vm0, %v994_v59  ;;  %v1089_v45 = vpop.f32.mrf.mxu2  ;;  %v1064_v61 = vpop.permute.xlu2 %1063 }
 0x38c   : > { %v1435_v62 = vpop.eup %1434  ;;  %v1066_v63 = vmul.f32 %v1064_v61, %v1060_v60 }
 0x38d   : > { %v1150_v0 = vmul.f32 %v1435_v62, %v1148_v55  ;;  %vm1155_vm13 = vweird.f32 %v1435_v62  ;;  %v1437_v17 = vpop.eup %1436 }
 0x38e   : > { %v1091_v1 = vadd.f32 %v1087_v51, %v1066_v63  ;;  %vm1156_vm1 = vmor %vm1154_vm15, %vm1155_vm13  ;;  %v1179_v18 = vmul.f32 %v1437_v17, %v1177_v16  ;;  %vm1184_vm2 = vweird.f32 %v1437_v17 }
 0x38f   : > { %v1151_v3 = vsub.f32 1.0, %v1150_v0  ;;  %v1109_v4 = vld [vmem:[#allocation4] sm:$0xff]  ;;  %vm1185_vm4 = vmor %vm1183_vm3, %vm1184_vm2 }
 0x390   : > { %1092 = vst.msk [vmem:[#allocation4 + $0x18] sm:$0xff] %vm326_vm0, %v1091_v1  ;;  %v992_v20 = vpop.f32.mrf.mxu3  ;;  %v1115_v6 = vmul.f32 %v1113_v2, %v1109_v4  ;;  %vm1159_vm0 = vcmp.eq.f32.partialorder %v1158_v8, 8.507059e+37  ;;  %v1180_v19 = vsub.f32 1.0, %v1179_v18 }
 0x391   : > { %v1152_v7 = vmul.f32 %v1435_v62, %v1151_v3 }
 0x392   : > { %v1116_v9 = vpack.c.bf16 %v1115_v6, %v1115_v6  ;;  %v1181_v24 = vmul.f32 %v1437_v17, %v1180_v19  ;;  %v1163_v33 = vld [vmem:[#allocation4 + $0x10] sm:$0xff] }
 0x393   : > { %v1153_v10 = vadd.f32 %v1435_v62, %v1152_v7 }
 0x394   : > { %1118 = vst.msk [vmem:[%s1644_s5] sm:$0xf] %vm1117_vm14, %v1116_v9  ;;  %v1182_v25 = vadd.f32 %v1437_v17, %v1181_v24 }
 0x395   : > { %v1157_v12 = vsel %vm1156_vm1, %v1435_v62, %v1153_v10 }
 0x396   : > { %v1162_v13 = vsel %vm1159_vm0, %v1161_v11, %v1157_v12  ;;  %v1186_v30 = vsel %vm1185_vm4, %v1437_v17, %v1182_v25 }
 0x397   : > { %1166 = vperm.xlu0 %1411, %v1162_v13   ;;  %v1191_v32 = vsel %vm1188_vm5, %v1190_v31, %v1186_v30  ;;  %v1192_v15 = vld [vmem:[#allocation4 + $0x18] sm:$0xff] }
 0x3b4   : > { %v1138_v22 = vpop.permute.xlu1 %1137 }
 0x3b5   : > { %v1140_v14 = vmul.f32 %v1138_v22, %v1134_v21 }
 0x3b7   : > { %v1141_v23 = vpack.c.bf16 %v1140_v14, %v1140_v14 }
 0x3b9   : > { %1143 = vrot.lane.b32.xlu2 %v1141_v23, %s1464_s25 }
 0x3c1   : > { %1195 = vperm.xlu2 %1412, %v1191_v32  }
 0x409   : > { %v1167_v34 = vpop.permute.xlu0 %1166 }
 0x40a   : > { %v1169_v35 = vmul.f32 %v1167_v34, %v1163_v33 }
 0x40c   : > { %v1170_v27 = vpack.c.bf16 %v1169_v35, %v1169_v35 }
 0x40e   : > { %1172 = vrot.lane.b32.xlu1 %v1170_v27, %s1463_s24 }
 0x413   : > { %v1144_v28 = vpop.permute.xlu2 %1143 }
 0x414   : > { %1147 = vst.msk [vmem:[%s1644_s5] sm:$0xf] %vm1146_vm6, %v1144_v28 }
 0x41b   : > { %v1196_v36 = vpop.permute.xlu2 %1195 }
 0x41c   : > { %v1198_v38 = vmul.f32 %v1196_v36, %v1192_v15 }
 0x41e   : > { %v1199_v37 = vpack.c.bf16 %v1198_v38, %v1198_v38 }
 0x420   : > { %1201 = vrot.lane.b32.xlu0 %v1199_v37, %s1462_s23 }
 0x480   : > { %v1173_v39 = vpop.permute.xlu1 %1172 }
 0x481   : > { %1176 = vst.msk [vmem:[%s1644_s5] sm:$0xf] %vm1175_vm7, %v1173_v39 }
 0x492   : > { %v1202_v40 = vpop.permute.xlu0 %1201 }
 0x493   : > { %1205 = vst.msk [vmem:[%s1644_s5] sm:$0xf] %vm1204_vm8, %v1202_v40 }
 0x494 PF: > { %s13_s14 = sadd.s32 1, %s1460_s14   ;;  %s1666_s12 = smov %s1456_s13 }
 0x495   : > { %p10_p5 = scmp.ge.s32.totalorder %s13_s14, 4   ;;  %s1667_s13 = smov %s1669_s15 }
 0x497   :  { %12 = sbr.rel (!%p10_p5) target bundleno = 2 (0x2), region = 98 }

</bundles_post_ra>
